<compile_context>
chip_gen: v6e
topology: v6e:2x2x1
jax: 0.10.0
libtpu: 0.0.40
codegen_flags: <defaults>
</compile_context>

<pallas_src>
import functools

import jax
import jax.numpy as jnp
from jax.experimental import pallas as pl
from jax.experimental.pallas import tpu as pltpu


def _sepconv_kernel(x_ref, wf_ref, o_ref, xpad_ref, acc_ref, *, K, pad, tile_h):
    # x_ref   : (1, H, W, Cin)              un-padded image of batch b (same block for
    #                                       every h step -> DMA'd once per batch)
    # wf_ref  : (K*K, Cin, Cout_pad)        fused depthwise*pointwise weights per tap
    # o_ref   : (1, tile_h, Wo, Cout_pad)   lane-dense output tile
    # xpad_ref: (Hp, Wp, Cin)               zero-padded image scratch (built once/batch)
    # acc_ref : (tile_h * Wo, Cout_pad)     f32 accumulator scratch
    h = pl.program_id(1)
    H, W, Cin = x_ref.shape[1], x_ref.shape[2], x_ref.shape[3]
    Wo = o_ref.shape[2]
    Cout_pad = o_ref.shape[3]

    # Fuse the zero padding into the kernel: materialize the padded image in VMEM
    # once per batch element (first h tile) instead of a jnp.pad HBM round trip.
    @pl.when(h == 0)
    def _():
        xpad_ref[...] = jnp.zeros_like(xpad_ref)
        xpad_ref[pl.ds(pad, H), pl.ds(pad, W), :] = x_ref[0]

    row0 = pl.multiple_of(h * tile_h, tile_h)  # top row of this tile (padded coords)

    # Depthwise + pointwise fused: K*K shifted MXU matmuls accumulated in f32 VMEM.
    for t in range(K * K):
        ki, kj = t // K, t % K
        tap = xpad_ref[pl.ds(row0 + ki, tile_h), pl.ds(kj, Wo), :]   # (tile_h, Wo, Cin)
        lhs = tap.reshape(tile_h * Wo, Cin)
        contrib = jnp.dot(lhs, wf_ref[t], preferred_element_type=jnp.float32)
        if t == 0:
            acc_ref[...] = contrib
        else:
            acc_ref[...] += contrib

    o_ref[...] = acc_ref[...].reshape(1, tile_h, Wo, Cout_pad).astype(o_ref.dtype)


def _pick_tile_h(Ho, max_rows=64):
    """Largest divisor of Ho that is <= max_rows; prefer >=2 tiles per image."""
    tile = 1
    for t in range(1, min(Ho, max_rows) + 1):
        if Ho % t == 0:
            tile = t
    if tile == Ho and Ho >= 8 and Ho % 2 == 0:
        tile = Ho // 2  # give the pipeline / megacore at least 2 steps per image
    return tile


def separable_conv2d(x_nchw, dw_weight, pw_weight, *, padding, tile_h=None,
                     compute_dtype=None):
    """SeparableConv2d forward.

    x_nchw   : (B, Cin, H, W)
    dw_weight: (Cin, 1, K, K)     depthwise weights (groups=Cin)
    pw_weight: (Cout, Cin, 1, 1)  pointwise 1x1 weights
    Returns  : (B, Cout, Ho, Wo) in NCHW, same dtype as x_nchw.
    """
    B, Cin, H, W = x_nchw.shape
    K = dw_weight.shape[-1]
    Cout = pw_weight.shape[0]
    Hp, Wp = H + 2 * padding, W + 2 * padding
    Ho, Wo = Hp - K + 1, Wp - K + 1
    Cout_pad = ((Cout + 127) // 128) * 128            # lane-dense output stores
    if compute_dtype is None:
        compute_dtype = x_nchw.dtype                  # pass jnp.bfloat16 on v6e/v7x
    if tile_h is None:
        tile_h = _pick_tile_h(Ho)
    assert Ho % tile_h == 0, (Ho, tile_h)
    nh = Ho // tile_h

    # NCHW -> NHWC (channels on the lane axis). Padding happens inside the kernel.
    x = jnp.transpose(x_nchw, (0, 2, 3, 1)).astype(compute_dtype)

    # Fuse depthwise into the pointwise matmul:
    #   out[h, w, o] = sum_{k, l, c} x[h+k-p, w+l-p, c] * dw[c, k, l] * pw[o, c]
    # -> one (Cin, Cout_pad) matrix per tap (k, l), zero-padded to a lane-dense Cout.
    dw = dw_weight[:, 0, :, :]                        # (Cin, K, K)
    pw = pw_weight[:, :, 0, 0]                        # (Cout, Cin)
    wf = jnp.einsum("ckl,oc->klco", dw, pw)           # (K, K, Cin, Cout)
    wf = jnp.pad(wf, ((0, 0), (0, 0), (0, 0), (0, Cout_pad - Cout)))
    wf = wf.reshape(K * K, Cin, Cout_pad).astype(compute_dtype)

    out_nhwc = pl.pallas_call(
        functools.partial(_sepconv_kernel, K=K, pad=padding, tile_h=tile_h),
        out_shape=jax.ShapeDtypeStruct((B, Ho, Wo, Cout_pad), x_nchw.dtype),
        grid_spec=pltpu.PrefetchScalarGridSpec(
            num_scalar_prefetch=0,
            grid=(B, nh),
            in_specs=[
                # Whole (un-padded) image of batch b; block index constant over the
                # h axis, so the pipeline DMAs it only once per batch.
                pl.BlockSpec((1, H, W, Cin), lambda b, h: (b, 0, 0, 0)),
                # Fused tap weights, resident for the whole grid.
                pl.BlockSpec((K * K, Cin, Cout_pad), lambda b, h: (0, 0, 0)),
            ],
            out_specs=pl.BlockSpec((1, tile_h, Wo, Cout_pad),
                                   lambda b, h: (b, h, 0, 0)),
            scratch_shapes=[
                pltpu.VMEM((Hp, Wp, Cin), compute_dtype),           # padded image
                pltpu.VMEM((tile_h * Wo, Cout_pad), jnp.float32),   # f32 accumulator
            ],
        ),
        compiler_params=pltpu.CompilerParams(
            # h carries the per-batch padded-image scratch -> must stay sequential;
            # batch axis is safe to shard across cores.
            dimension_semantics=("parallel", "arbitrary"),
            vmem_limit_bytes=64 * 1024 * 1024,
        ),
    )(x, wf)

    # Drop the lane padding on Cout, NHWC -> NCHW (PyTorch convention).
    return jnp.transpose(out_nhwc[..., :Cout], (0, 3, 1, 2))


def _reference(x_nchw, dw_weight, pw_weight, *, padding):
    """Plain-JAX reference (lax conv) for correctness checking."""
    Cin = x_nchw.shape[1]
    y = jax.lax.conv_general_dilated(
        x_nchw, dw_weight, window_strides=(1, 1),
        padding=[(padding, padding), (padding, padding)],
        dimension_numbers=("NCHW", "OIHW", "NCHW"),
        feature_group_count=Cin)
    y = jax.lax.conv_general_dilated(
        y, pw_weight, window_strides=(1, 1), padding=[(0, 0), (0, 0)],
        dimension_numbers=("NCHW", "OIHW", "NCHW"))
    return y


if __name__ == "__main__":
    B, Cin, Cout, H, W = 2, 4, 8, 16, 16
    K, PAD = 3, 1  # SeparableConv2d(Cin, Cout, kernel_size=3, padding=1, bias=False)

    key = jax.random.PRNGKey(0)
    kx, kdw, kpw = jax.random.split(key, 3)
    x = jax.random.normal(kx, (B, Cin, H, W), dtype=jnp.float32)
    # conv1.weight: (Cin, 1, K, K) (groups=Cin); pointwise.weight: (Cout, Cin, 1, 1)
    dw_weight = jax.random.normal(kdw, (Cin, 1, K, K), dtype=jnp.float32) * 0.1
    pw_weight = jax.random.normal(kpw, (Cout, Cin, 1, 1), dtype=jnp.float32) * 0.1

    out = separable_conv2d(x, dw_weight, pw_weight, padding=PAD)
    out = jax.block_until_ready(out)

    ref = _reference(x, dw_weight, pw_weight, padding=PAD)
    assert out.shape == (B, Cout, H, W), out.shape
    # Tolerance covers the legitimate change of summation order from the tap-fused
    # MXU formulation vs. the two-stage lax conv reference.
    assert jnp.allclose(out, ref, atol=1e-3, rtol=1e-3), float(
        jnp.max(jnp.abs(out - ref)))

    print("KERNEL_OK")
</pallas_src>

<mosaic_0001>
module attributes {stable_mosaic.version = 11 : i64} {
  func.func @_sepconv_kernel(%arg0: i32, %arg1: i32, %arg2: memref<1x16x16x4xf32, #tpu.memory_space<vmem>>, %arg3: memref<9x4x128xf32, #tpu.memory_space<vmem>>, %arg4: memref<1x8x16x128xf32, #tpu.memory_space<vmem>>, %arg5: memref<18x18x4xf32, #tpu.memory_space<vmem>>, %arg6: memref<128x128xf32, #tpu.memory_space<vmem>>) attributes {dimension_semantics = [#tpu.dimension_semantics<parallel>, #tpu.dimension_semantics<arbitrary>], iteration_bounds = array<i64: 2, 2>, scalar_prefetch = 0 : i64, scratch_operands = 2 : i64, tpu.core_type = #tpu.core_type<tc>, window_params = [{transform_indices = @transform_0, window_bounds = array<i64: 1, 16, 16, 4>}, {pipeline_mode = #tpu.pipeline_mode<synchronous>, transform_indices = @transform_1, window_bounds = array<i64: 9, 4, 128>}, {transform_indices = @transform_2, window_bounds = array<i64: 1, 8, 16, 128>}]} {
    %c0_i32 = arith.constant 0 : i32
    %0 = arith.cmpi eq, %arg1, %c0_i32 : i32
    %1 = arith.extui %0 : i1 to i32
    %c0_i32_0 = arith.constant 0 : i32
    %2 = arith.cmpi ne, %1, %c0_i32_0 : i32
    scf.if %2 {
      %cst_92 = arith.constant 0.000000e+00 : f32
      %96 = vector.broadcast %cst_92 : f32 to vector<18x18x4xf32>
      %c0_93 = arith.constant 0 : index
      %c0_94 = arith.constant 0 : index
      %c0_95 = arith.constant 0 : index
      %97 = vector.load %arg5[%c0_93, %c0_94, %c0_95] : memref<18x18x4xf32, #tpu.memory_space<vmem>>, vector<18x18x4xf32>
      tpu.vector_store %arg5[%c0_93, %c0_94, %c0_95], %96 {strides = array<i32>} : memref<18x18x4xf32, #tpu.memory_space<vmem>>, vector<18x18x4xf32>,
      %c0_96 = arith.constant 0 : index
      %c0_97 = arith.constant 0 : index
      %c0_98 = arith.constant 0 : index
      %c0_99 = arith.constant 0 : index
      %98 = vector.load %arg2[%c0_96, %c0_97, %c0_98, %c0_99] : memref<1x16x16x4xf32, #tpu.memory_space<vmem>>, vector<1x16x16x4xf32>
      %99 = vector.shape_cast %98 : vector<1x16x16x4xf32> to vector<16x16x4xf32>
      %c1_100 = arith.constant 1 : index
      %c1_101 = arith.constant 1 : index
      %c0_102 = arith.constant 0 : index
      %100 = vector.load %arg5[%c1_100, %c1_101, %c0_102] : memref<18x18x4xf32, #tpu.memory_space<vmem>>, vector<16x16x4xf32>
      tpu.vector_store %arg5[%c1_100, %c1_101, %c0_102], %99 {strides = array<i32>} : memref<18x18x4xf32, #tpu.memory_space<vmem>>, vector<16x16x4xf32>,
    } else {
    }
    %c8_i32 = arith.constant 8 : i32
    %3 = arith.muli %arg1, %c8_i32 : i32
    %4 = tpu.assume_multiple %3, 8 : i32
    %c0_i32_1 = arith.constant 0 : i32
    %5 = arith.addi %4, %c0_i32_1 : i32
    %6 = arith.index_cast %5 : i32 to index
    %c0 = arith.constant 0 : index
    %c0_2 = arith.constant 0 : index
    %7 = vector.load %arg5[%6, %c0, %c0_2] : memref<18x18x4xf32, #tpu.memory_space<vmem>>, vector<8x16x4xf32>
    %8 = vector.shape_cast %7 : vector<8x16x4xf32> to vector<128x4xf32>
    %c0_3 = arith.constant 0 : index
    %c0_4 = arith.constant 0 : index
    %c0_5 = arith.constant 0 : index
    %9 = vector.load %arg3[%c0_3, %c0_4, %c0_5] : memref<9x4x128xf32, #tpu.memory_space<vmem>>, vector<1x4x128xf32>
    %10 = vector.shape_cast %9 : vector<1x4x128xf32> to vector<4x128xf32>
    %cst = arith.constant dense<0.000000e+00> : vector<128x128xf32>
    %11 = tpu.matmul %8, %10, %cst {dimension_numbers = #tpu.dot_dimension_numbers<[1], [0], [0], [1], [0, 0, 1, 1], [], []>} : vector<128x4xf32>, vector<4x128xf32>, vector<128x128xf32> -> vector<128x128xf32>
    %c0_6 = arith.constant 0 : index
    %c0_7 = arith.constant 0 : index
    %12 = vector.load %arg6[%c0_6, %c0_7] : memref<128x128xf32, #tpu.memory_space<vmem>>, vector<128x128xf32>
    tpu.vector_store %arg6[%c0_6, %c0_7], %11 {strides = array<i32>} : memref<128x128xf32, #tpu.memory_space<vmem>>, vector<128x128xf32>,
    %c0_i32_8 = arith.constant 0 : i32
    %13 = arith.addi %4, %c0_i32_8 : i32
    %14 = arith.index_cast %13 : i32 to index
    %c1 = arith.constant 1 : index
    %c0_9 = arith.constant 0 : index
    %15 = vector.load %arg5[%14, %c1, %c0_9] : memref<18x18x4xf32, #tpu.memory_space<vmem>>, vector<8x16x4xf32>
    %16 = vector.shape_cast %15 : vector<8x16x4xf32> to vector<128x4xf32>
    %c1_10 = arith.constant 1 : index
    %c0_11 = arith.constant 0 : index
    %c0_12 = arith.constant 0 : index
    %17 = vector.load %arg3[%c1_10, %c0_11, %c0_12] : memref<9x4x128xf32, #tpu.memory_space<vmem>>, vector<1x4x128xf32>
    %18 = vector.shape_cast %17 : vector<1x4x128xf32> to vector<4x128xf32>
    %cst_13 = arith.constant dense<0.000000e+00> : vector<128x128xf32>
    %19 = tpu.matmul %16, %18, %cst_13 {dimension_numbers = #tpu.dot_dimension_numbers<[1], [0], [0], [1], [0, 0, 1, 1], [], []>} : vector<128x4xf32>, vector<4x128xf32>, vector<128x128xf32> -> vector<128x128xf32>
    %c0_14 = arith.constant 0 : index
    %c0_15 = arith.constant 0 : index
    %20 = vector.load %arg6[%c0_14, %c0_15] : memref<128x128xf32, #tpu.memory_space<vmem>>, vector<128x128xf32>
    %21 = arith.addf %20, %19 : vector<128x128xf32>
    %c0_16 = arith.constant 0 : index
    %c0_17 = arith.constant 0 : index
    %22 = vector.load %arg6[%c0_16, %c0_17] : memref<128x128xf32, #tpu.memory_space<vmem>>, vector<128x128xf32>
    tpu.vector_store %arg6[%c0_16, %c0_17], %21 {strides = array<i32>} : memref<128x128xf32, #tpu.memory_space<vmem>>, vector<128x128xf32>,
    %c0_i32_18 = arith.constant 0 : i32
    %23 = arith.addi %4, %c0_i32_18 : i32
    %24 = arith.index_cast %23 : i32 to index
    %c2 = arith.constant 2 : index
    %c0_19 = arith.constant 0 : index
    %25 = vector.load %arg5[%24, %c2, %c0_19] : memref<18x18x4xf32, #tpu.memory_space<vmem>>, vector<8x16x4xf32>
    %26 = vector.shape_cast %25 : vector<8x16x4xf32> to vector<128x4xf32>
    %c2_20 = arith.constant 2 : index
    %c0_21 = arith.constant 0 : index
    %c0_22 = arith.constant 0 : index
    %27 = vector.load %arg3[%c2_20, %c0_21, %c0_22] : memref<9x4x128xf32, #tpu.memory_space<vmem>>, vector<1x4x128xf32>
    %28 = vector.shape_cast %27 : vector<1x4x128xf32> to vector<4x128xf32>
    %cst_23 = arith.constant dense<0.000000e+00> : vector<128x128xf32>
    %29 = tpu.matmul %26, %28, %cst_23 {dimension_numbers = #tpu.dot_dimension_numbers<[1], [0], [0], [1], [0, 0, 1, 1], [], []>} : vector<128x4xf32>, vector<4x128xf32>, vector<128x128xf32> -> vector<128x128xf32>
    %c0_24 = arith.constant 0 : index
    %c0_25 = arith.constant 0 : index
    %30 = vector.load %arg6[%c0_24, %c0_25] : memref<128x128xf32, #tpu.memory_space<vmem>>, vector<128x128xf32>
    %31 = arith.addf %30, %29 : vector<128x128xf32>
    %c0_26 = arith.constant 0 : index
    %c0_27 = arith.constant 0 : index
    %32 = vector.load %arg6[%c0_26, %c0_27] : memref<128x128xf32, #tpu.memory_space<vmem>>, vector<128x128xf32>
    tpu.vector_store %arg6[%c0_26, %c0_27], %31 {strides = array<i32>} : memref<128x128xf32, #tpu.memory_space<vmem>>, vector<128x128xf32>,
    %c1_i32 = arith.constant 1 : i32
    %33 = arith.addi %4, %c1_i32 : i32
    %34 = arith.index_cast %33 : i32 to index
    %c0_28 = arith.constant 0 : index
    %c0_29 = arith.constant 0 : index
    %35 = vector.load %arg5[%34, %c0_28, %c0_29] : memref<18x18x4xf32, #tpu.memory_space<vmem>>, vector<8x16x4xf32>
    %36 = vector.shape_cast %35 : vector<8x16x4xf32> to vector<128x4xf32>
    %c3 = arith.constant 3 : index
    %c0_30 = arith.constant 0 : index
    %c0_31 = arith.constant 0 : index
    %37 = vector.load %arg3[%c3, %c0_30, %c0_31] : memref<9x4x128xf32, #tpu.memory_space<vmem>>, vector<1x4x128xf32>
    %38 = vector.shape_cast %37 : vector<1x4x128xf32> to vector<4x128xf32>
    %cst_32 = arith.constant dense<0.000000e+00> : vector<128x128xf32>
    %39 = tpu.matmul %36, %38, %cst_32 {dimension_numbers = #tpu.dot_dimension_numbers<[1], [0], [0], [1], [0, 0, 1, 1], [], []>} : vector<128x4xf32>, vector<4x128xf32>, vector<128x128xf32> -> vector<128x128xf32>
    %c0_33 = arith.constant 0 : index
    %c0_34 = arith.constant 0 : index
    %40 = vector.load %arg6[%c0_33, %c0_34] : memref<128x128xf32, #tpu.memory_space<vmem>>, vector<128x128xf32>
    %41 = arith.addf %40, %39 : vector<128x128xf32>
    %c0_35 = arith.constant 0 : index
    %c0_36 = arith.constant 0 : index
    %42 = vector.load %arg6[%c0_35, %c0_36] : memref<128x128xf32, #tpu.memory_space<vmem>>, vector<128x128xf32>
    tpu.vector_store %arg6[%c0_35, %c0_36], %41 {strides = array<i32>} : memref<128x128xf32, #tpu.memory_space<vmem>>, vector<128x128xf32>,
    %c1_i32_37 = arith.constant 1 : i32
    %43 = arith.addi %4, %c1_i32_37 : i32
    %44 = arith.index_cast %43 : i32 to index
    %c1_38 = arith.constant 1 : index
    %c0_39 = arith.constant 0 : index
    %45 = vector.load %arg5[%44, %c1_38, %c0_39] : memref<18x18x4xf32, #tpu.memory_space<vmem>>, vector<8x16x4xf32>
    %46 = vector.shape_cast %45 : vector<8x16x4xf32> to vector<128x4xf32>
    %c4 = arith.constant 4 : index
    %c0_40 = arith.constant 0 : index
    %c0_41 = arith.constant 0 : index
    %47 = vector.load %arg3[%c4, %c0_40, %c0_41] : memref<9x4x128xf32, #tpu.memory_space<vmem>>, vector<1x4x128xf32>
    %48 = vector.shape_cast %47 : vector<1x4x128xf32> to vector<4x128xf32>
    %cst_42 = arith.constant dense<0.000000e+00> : vector<128x128xf32>
    %49 = tpu.matmul %46, %48, %cst_42 {dimension_numbers = #tpu.dot_dimension_numbers<[1], [0], [0], [1], [0, 0, 1, 1], [], []>} : vector<128x4xf32>, vector<4x128xf32>, vector<128x128xf32> -> vector<128x128xf32>
    %c0_43 = arith.constant 0 : index
    %c0_44 = arith.constant 0 : index
    %50 = vector.load %arg6[%c0_43, %c0_44] : memref<128x128xf32, #tpu.memory_space<vmem>>, vector<128x128xf32>
    %51 = arith.addf %50, %49 : vector<128x128xf32>
    %c0_45 = arith.constant 0 : index
    %c0_46 = arith.constant 0 : index
    %52 = vector.load %arg6[%c0_45, %c0_46] : memref<128x128xf32, #tpu.memory_space<vmem>>, vector<128x128xf32>
    tpu.vector_store %arg6[%c0_45, %c0_46], %51 {strides = array<i32>} : memref<128x128xf32, #tpu.memory_space<vmem>>, vector<128x128xf32>,
    %c1_i32_47 = arith.constant 1 : i32
    %53 = arith.addi %4, %c1_i32_47 : i32
    %54 = arith.index_cast %53 : i32 to index
    %c2_48 = arith.constant 2 : index
    %c0_49 = arith.constant 0 : index
    %55 = vector.load %arg5[%54, %c2_48, %c0_49] : memref<18x18x4xf32, #tpu.memory_space<vmem>>, vector<8x16x4xf32>
    %56 = vector.shape_cast %55 : vector<8x16x4xf32> to vector<128x4xf32>
    %c5 = arith.constant 5 : index
    %c0_50 = arith.constant 0 : index
    %c0_51 = arith.constant 0 : index
    %57 = vector.load %arg3[%c5, %c0_50, %c0_51] : memref<9x4x128xf32, #tpu.memory_space<vmem>>, vector<1x4x128xf32>
    %58 = vector.shape_cast %57 : vector<1x4x128xf32> to vector<4x128xf32>
    %cst_52 = arith.constant dense<0.000000e+00> : vector<128x128xf32>
    %59 = tpu.matmul %56, %58, %cst_52 {dimension_numbers = #tpu.dot_dimension_numbers<[1], [0], [0], [1], [0, 0, 1, 1], [], []>} : vector<128x4xf32>, vector<4x128xf32>, vector<128x128xf32> -> vector<128x128xf32>
    %c0_53 = arith.constant 0 : index
    %c0_54 = arith.constant 0 : index
    %60 = vector.load %arg6[%c0_53, %c0_54] : memref<128x128xf32, #tpu.memory_space<vmem>>, vector<128x128xf32>
    %61 = arith.addf %60, %59 : vector<128x128xf32>
    %c0_55 = arith.constant 0 : index
    %c0_56 = arith.constant 0 : index
    %62 = vector.load %arg6[%c0_55, %c0_56] : memref<128x128xf32, #tpu.memory_space<vmem>>, vector<128x128xf32>
    tpu.vector_store %arg6[%c0_55, %c0_56], %61 {strides = array<i32>} : memref<128x128xf32, #tpu.memory_space<vmem>>, vector<128x128xf32>,
    %c2_i32 = arith.constant 2 : i32
    %63 = arith.addi %4, %c2_i32 : i32
    %64 = arith.index_cast %63 : i32 to index
    %c0_57 = arith.constant 0 : index
    %c0_58 = arith.constant 0 : index
    %65 = vector.load %arg5[%64, %c0_57, %c0_58] : memref<18x18x4xf32, #tpu.memory_space<vmem>>, vector<8x16x4xf32>
    %66 = vector.shape_cast %65 : vector<8x16x4xf32> to vector<128x4xf32>
    %c6 = arith.constant 6 : index
    %c0_59 = arith.constant 0 : index
    %c0_60 = arith.constant 0 : index
    %67 = vector.load %arg3[%c6, %c0_59, %c0_60] : memref<9x4x128xf32, #tpu.memory_space<vmem>>, vector<1x4x128xf32>
    %68 = vector.shape_cast %67 : vector<1x4x128xf32> to vector<4x128xf32>
    %cst_61 = arith.constant dense<0.000000e+00> : vector<128x128xf32>
    %69 = tpu.matmul %66, %68, %cst_61 {dimension_numbers = #tpu.dot_dimension_numbers<[1], [0], [0], [1], [0, 0, 1, 1], [], []>} : vector<128x4xf32>, vector<4x128xf32>, vector<128x128xf32> -> vector<128x128xf32>
    %c0_62 = arith.constant 0 : index
    %c0_63 = arith.constant 0 : index
    %70 = vector.load %arg6[%c0_62, %c0_63] : memref<128x128xf32, #tpu.memory_space<vmem>>, vector<128x128xf32>
    %71 = arith.addf %70, %69 : vector<128x128xf32>
    %c0_64 = arith.constant 0 : index
    %c0_65 = arith.constant 0 : index
    %72 = vector.load %arg6[%c0_64, %c0_65] : memref<128x128xf32, #tpu.memory_space<vmem>>, vector<128x128xf32>
    tpu.vector_store %arg6[%c0_64, %c0_65], %71 {strides = array<i32>} : memref<128x128xf32, #tpu.memory_space<vmem>>, vector<128x128xf32>,
    %c2_i32_66 = arith.constant 2 : i32
    %73 = arith.addi %4, %c2_i32_66 : i32
    %74 = arith.index_cast %73 : i32 to index
    %c1_67 = arith.constant 1 : index
    %c0_68 = arith.constant 0 : index
    %75 = vector.load %arg5[%74, %c1_67, %c0_68] : memref<18x18x4xf32, #tpu.memory_space<vmem>>, vector<8x16x4xf32>
    %76 = vector.shape_cast %75 : vector<8x16x4xf32> to vector<128x4xf32>
    %c7 = arith.constant 7 : index
    %c0_69 = arith.constant 0 : index
    %c0_70 = arith.constant 0 : index
    %77 = vector.load %arg3[%c7, %c0_69, %c0_70] : memref<9x4x128xf32, #tpu.memory_space<vmem>>, vector<1x4x128xf32>
    %78 = vector.shape_cast %77 : vector<1x4x128xf32> to vector<4x128xf32>
    %cst_71 = arith.constant dense<0.000000e+00> : vector<128x128xf32>
    %79 = tpu.matmul %76, %78, %cst_71 {dimension_numbers = #tpu.dot_dimension_numbers<[1], [0], [0], [1], [0, 0, 1, 1], [], []>} : vector<128x4xf32>, vector<4x128xf32>, vector<128x128xf32> -> vector<128x128xf32>
    %c0_72 = arith.constant 0 : index
    %c0_73 = arith.constant 0 : index
    %80 = vector.load %arg6[%c0_72, %c0_73] : memref<128x128xf32, #tpu.memory_space<vmem>>, vector<128x128xf32>
    %81 = arith.addf %80, %79 : vector<128x128xf32>
    %c0_74 = arith.constant 0 : index
    %c0_75 = arith.constant 0 : index
    %82 = vector.load %arg6[%c0_74, %c0_75] : memref<128x128xf32, #tpu.memory_space<vmem>>, vector<128x128xf32>
    tpu.vector_store %arg6[%c0_74, %c0_75], %81 {strides = array<i32>} : memref<128x128xf32, #tpu.memory_space<vmem>>, vector<128x128xf32>,
    %c2_i32_76 = arith.constant 2 : i32
    %83 = arith.addi %4, %c2_i32_76 : i32
    %84 = arith.index_cast %83 : i32 to index
    %c2_77 = arith.constant 2 : index
    %c0_78 = arith.constant 0 : index
    %85 = vector.load %arg5[%84, %c2_77, %c0_78] : memref<18x18x4xf32, #tpu.memory_space<vmem>>, vector<8x16x4xf32>
    %86 = vector.shape_cast %85 : vector<8x16x4xf32> to vector<128x4xf32>
    %c8 = arith.constant 8 : index
    %c0_79 = arith.constant 0 : index
    %c0_80 = arith.constant 0 : index
    %87 = vector.load %arg3[%c8, %c0_79, %c0_80] : memref<9x4x128xf32, #tpu.memory_space<vmem>>, vector<1x4x128xf32>
    %88 = vector.shape_cast %87 : vector<1x4x128xf32> to vector<4x128xf32>
    %cst_81 = arith.constant dense<0.000000e+00> : vector<128x128xf32>
    %89 = tpu.matmul %86, %88, %cst_81 {dimension_numbers = #tpu.dot_dimension_numbers<[1], [0], [0], [1], [0, 0, 1, 1], [], []>} : vector<128x4xf32>, vector<4x128xf32>, vector<128x128xf32> -> vector<128x128xf32>
    %c0_82 = arith.constant 0 : index
    %c0_83 = arith.constant 0 : index
    %90 = vector.load %arg6[%c0_82, %c0_83] : memref<128x128xf32, #tpu.memory_space<vmem>>, vector<128x128xf32>
    %91 = arith.addf %90, %89 : vector<128x128xf32>
    %c0_84 = arith.constant 0 : index
    %c0_85 = arith.constant 0 : index
    %92 = vector.load %arg6[%c0_84, %c0_85] : memref<128x128xf32, #tpu.memory_space<vmem>>, vector<128x128xf32>
    tpu.vector_store %arg6[%c0_84, %c0_85], %91 {strides = array<i32>} : memref<128x128xf32, #tpu.memory_space<vmem>>, vector<128x128xf32>,
    %c0_86 = arith.constant 0 : index
    %c0_87 = arith.constant 0 : index
    %93 = vector.load %arg6[%c0_86, %c0_87] : memref<128x128xf32, #tpu.memory_space<vmem>>, vector<128x128xf32>
    %94 = vector.shape_cast %93 : vector<128x128xf32> to vector<1x8x16x128xf32>
    %c0_88 = arith.constant 0 : index
    %c0_89 = arith.constant 0 : index
    %c0_90 = arith.constant 0 : index
    %c0_91 = arith.constant 0 : index
    %95 = vector.load %arg4[%c0_88, %c0_89, %c0_90, %c0_91] : memref<1x8x16x128xf32, #tpu.memory_space<vmem>>, vector<1x8x16x128xf32>
    tpu.vector_store %arg4[%c0_88, %c0_89, %c0_90, %c0_91], %94 {strides = array<i32>} : memref<1x8x16x128xf32, #tpu.memory_space<vmem>>, vector<1x8x16x128xf32>,
    return
  }
  func.func @transform_0(%arg0: i32, %arg1: i32) -> (i32, i32, i32, i32) {
    %c0_i32 = arith.constant 0 : i32
    %c0_i32_0 = arith.constant 0 : i32
    %c0_i32_1 = arith.constant 0 : i32
    %c0_i32_2 = arith.constant 0 : i32
    return %arg0, %c0_i32, %c0_i32_0, %c0_i32_1 : i32, i32, i32, i32
  }
  func.func @transform_1(%arg0: i32, %arg1: i32) -> (i32, i32, i32) {
    %c0_i32 = arith.constant 0 : i32
    %c0_i32_0 = arith.constant 0 : i32
    %c0_i32_1 = arith.constant 0 : i32
    %c0_i32_2 = arith.constant 0 : i32
    return %c0_i32, %c0_i32_0, %c0_i32_1 : i32, i32, i32
  }
  func.func @transform_2(%arg0: i32, %arg1: i32) -> (i32, i32, i32, i32) {
    %c0_i32 = arith.constant 0 : i32
    %c0_i32_0 = arith.constant 0 : i32
    %c0_i32_1 = arith.constant 0 : i32
    return %arg0, %arg1, %c0_i32, %c0_i32_0 : i32, i32, i32, i32
  }
}

</mosaic_0001>

<bundles_post_ra>
// kernel: tpu_custom_call.1
= control target key start
LH: loop header
LB: loop body
LE: loop exit
PB: predicated region body
PF: predicated region fallthrough
CT: control target
= control target key end

     0   :  { %7 = vsyncpa [#allocation5], 0  ;;  %s4550_s0 = inlined_call_operand.vmem [shape: f32[2,16,16,4], index: 0, kind: input, shape index: {}]   ;;  %s4551_s1 = inlined_call_operand.vmem [shape: f32[9,4,128], index: 1, kind: input, shape index: {}]   ;;  %s4552_s2 = inlined_call_operand.hbm [shape: f32[2,16,16,128], index: 2, kind: output, shape index: {}]  }
   0x1   :  { %9 = vsyncpa [#allocation5 + $0x1], 0  ;;  %s3610_s9 = smov 0   ;;  %s3612_s10 = smov 0  }
   0x2   :  { %s3614_s11 = smov 0   ;;  %s3616_s12 = smov 0  }
   0x3   :  { %s3618_s13 = smov 0   ;;  %s3620_s14 = smov 0  }
   0x4   :  { %s3622_s15 = smov 0   ;;  %s3624_s16 = smov 0  }
   0x5 LB: > { %s2753_s17 = sadd.s32 4294967295, %s3589_s16   ;;  %s2754_s18 = sadd.s32 4294967294, %s3589_s16   ;;  %s3589_s16 = sphi %s3624_s16, %s15_s16   ;;  %s3585_s15 = sphi %s3622_s15, %s4601_s15   ;;  %s3581_s14 = sphi %s3620_s14, %s4600_s14   ;;  %s3577_s13 = sphi %s3618_s13, %s4599_s13   ;;  %s3573_s12 = sphi %s3616_s12, %s4598_s12   ;;  %s3569_s11 = sphi %s3614_s11, %s4597_s11   ;;  %s3565_s10 = sphi %s3612_s10, %s4596_s10   ;;  %s3561_s9 = sphi %s3610_s9, %s4595_s9  }
   0x6   : > { %s24_s19 = sadd.s32 1, %s3581_s14  ;;  %s27_s20 = sadd.s32 1, %s3585_s15 }
   0x7   : > { %p25_p0 = scmp.ge.s32.totalorder %s24_s19, 2  ;;  %p93_p1 = scmp.ne.s32.totalorder %s3569_s11, %s3565_s10 }
   0x8   : > { %p94_p2 = scmp.eq.s32.totalorder %s2753_s17, 3  ;;  %p99_p5 = scmp.ne.s32.totalorder %s3565_s10, %s3561_s9 }
   0x9   : > { %s4603_s19 = smov (%p25_p0, %s24_s19), 0  ;;  %s4605_s20 = smov (!%p25_p0, %s27_s20), %s3585_s15 }
   0xa   : > { %s79_s21 = ssub.s32 %s3581_s14, %s4603_s19  ;;  %p3661_p3 = por %p94_p2, %p93_p1 }
   0xb   : > { %p29_p4 = scmp.ge.s32.totalorder %s4605_s20, 2  ;;  %p100_p6 = scmp.eq.s32.totalorder %s2754_s18, 3 }
   0xc   : > { %p2757_p7 = scmp.ge.s32.totalorder %s3589_s16, 1  ;;  %p129_p9 = scmp.lt.s32.totalorder %s3589_s16, 5 }
   0xd   : > { %s4607_s20 = smov (%p29_p4, %s4605_s20), 0  ;;  %p3670_p8 = por %p100_p6, %p99_p5 }
   0xe   : > { %s78_s24 = ssub.s32 %s3585_s15, %s4607_s20  ;;  %s83_s25 = sadd.s32 1, %s3569_s11 }
   0xf   : > { %s80_s26 = sor.u32 %s79_s21, %s78_s24  ;;  %p130_p10 = pnand %p2757_p7, %p129_p9 }
  0x10   : > { %p81_p11 = scmp.eq.s32.totalorder %s80_s26, 0 }
  0x11   : > { %133 = sbr.rel (%p130_p10) target bundleno = 436 (0x1b4), region = 28 }
  0x12   : > { %s3679_s27 = scalar_select %p81_p11, %s3569_s11, %s83_s25  }
  0x16   : > { %s148_s28 = sand.u32 1, %s3565_s10   ;;  %p151_p12 = scmp.lt.s32.totalorder %s3577_s13, 1 }
  0x17   : > { %s2758_s29 = sshll.u32 %s148_s28, 7  ;;  %p2761_p13 = scmp.ne.s32.totalorder %s3573_s12, 0 }
  0x18   : > { %s152_s30 = scalar_select %p151_p12, %s3577_s13, 1 }
  0x19   : > { %s3691_s7 = scalar_lea.vmem [#allocation4], %s2758_s29  ;;  %160 = sbr.rel (%p2761_p13) target bundleno = 74 (0x4a), region = 32 }
  0x1a   : > { %s3032_s3 = sshll.u32 %s152_s30, 8 }
  0x1b   : > { %s3689_s6 = scalar_lea.vmem %s4550_s0, %s3032_s3 }
  0x1e   : > { %vm161_vm0 = vcmask 31744   ;;  %vm164_vm1 = vcmask 25600   ;;  %v217_v0 = vld [vmem:[%s3689_s6] sm:$0xff]  ;;  %v218_v1 = vld [vmem:[%s3689_s6 + $0x8] sm:$0xff]  ;;  %v219_v2 = vld [vmem:[%s3689_s6 + $0x10] sm:$0xff]  ;;  %v3591_v3 = vmov 0.0  }
  0x1f   : > { %166 = vst.msk [vmem:[#allocation2 + $0x18] sm:$0xff] %vm161_vm0, %v3591_v3  ;;  %162 = vst.msk [vmem:[#allocation2] sm:$0xff] %vm161_vm0, %v3591_v3  ;;  %v220_v4 = vld [vmem:[%s3689_s6 + $0x18] sm:$0xff]  ;;  %v221_v5 = vld [vmem:[%s3689_s6 + $0x20] sm:$0xff] }
  0x20   : > { %163 = vst.msk [vmem:[#allocation2 + $0x8] sm:$0xff] %vm161_vm0, %v3591_v3  ;;  %167 = vst.msk [vmem:[#allocation2 + $0x20] sm:$0xff] %vm161_vm0, %v3591_v3  ;;  %v222_v6 = vld [vmem:[%s3689_s6 + $0x28] sm:$0xff]  ;;  %v223_v7 = vld [vmem:[%s3689_s6 + $0x30] sm:$0xff] }
  0x21   : > { %169 = vst.msk [vmem:[#allocation2 + $0x30] sm:$0xff] %vm161_vm0, %v3591_v3  ;;  %170 = vst.msk [vmem:[#allocation2 + $0x38] sm:$0xff] %vm161_vm0, %v3591_v3  ;;  %v224_v8 = vld [vmem:[%s3689_s6 + $0x38] sm:$0xff]  ;;  %v225_v9 = vld [vmem:[%s3689_s6 + $0x40] sm:$0xff] }
  0x22   : > { %172 = vst.msk [vmem:[#allocation2 + $0x48] sm:$0xff] %vm161_vm0, %v3591_v3  ;;  %173 = vst.msk [vmem:[#allocation2 + $0x50] sm:$0xff] %vm161_vm0, %v3591_v3  ;;  %v226_v10 = vld [vmem:[%s3689_s6 + $0x48] sm:$0xff]  ;;  %v227_v11 = vld [vmem:[%s3689_s6 + $0x50] sm:$0xff] }
  0x23   : > { %175 = vst.msk [vmem:[#allocation2 + $0x60] sm:$0xff] %vm161_vm0, %v3591_v3  ;;  %176 = vst.msk [vmem:[#allocation2 + $0x68] sm:$0xff] %vm161_vm0, %v3591_v3  ;;  %v228_v12 = vld [vmem:[%s3689_s6 + $0x58] sm:$0xff]  ;;  %v229_v13 = vld [vmem:[%s3689_s6 + $0x60] sm:$0xff] }
  0x24   : > { %178 = vst.msk [vmem:[#allocation2 + $0x78] sm:$0xff] %vm161_vm0, %v3591_v3  ;;  %179 = vst.msk [vmem:[#allocation2 + $0x80] sm:$0xff] %vm161_vm0, %v3591_v3  ;;  %v230_v14 = vld [vmem:[%s3689_s6 + $0x68] sm:$0xff]  ;;  %v231_v15 = vld [vmem:[%s3689_s6 + $0x70] sm:$0xff] }
  0x25   : > { %181 = vst.msk [vmem:[#allocation2 + $0x90] sm:$0xff] %vm161_vm0, %v3591_v3  ;;  %182 = vst.msk [vmem:[#allocation2 + $0x98] sm:$0xff] %vm161_vm0, %v3591_v3  ;;  %v232_v16 = vld [vmem:[%s3689_s6 + $0x78] sm:$0xff]  ;;  %v233_v17 = vld [vmem:[%s3689_s6 + $0x80] sm:$0xff] }
  0x26   : > { %184 = vst.msk [vmem:[#allocation2 + $0xa8] sm:$0xff] %vm161_vm0, %v3591_v3  ;;  %185 = vst.msk [vmem:[#allocation2 + $0xb0] sm:$0xff] %vm161_vm0, %v3591_v3  ;;  %v234_v18 = vld [vmem:[%s3689_s6 + $0x88] sm:$0xff]  ;;  %v235_v19 = vld [vmem:[%s3689_s6 + $0x90] sm:$0xff] }
  0x27   : > { %187 = vst.msk [vmem:[#allocation2 + $0xc0] sm:$0xff] %vm161_vm0, %v3591_v3  ;;  %188 = vst.msk [vmem:[#allocation2 + $0xc8] sm:$0xff] %vm161_vm0, %v3591_v3  ;;  %v236_v20 = vld [vmem:[%s3689_s6 + $0x98] sm:$0xff]  ;;  %v237_v21 = vld [vmem:[%s3689_s6 + $0xa0] sm:$0xff] }
  0x28   : > { %190 = vst.msk [vmem:[#allocation2 + $0xd8] sm:$0xff] %vm161_vm0, %v3591_v3  ;;  %191 = vst.msk [vmem:[#allocation2 + $0xe0] sm:$0xff] %vm161_vm0, %v3591_v3  ;;  %v238_v22 = vld [vmem:[%s3689_s6 + $0xa8] sm:$0xff]  ;;  %v239_v23 = vld [vmem:[%s3689_s6 + $0xb0] sm:$0xff] }
  0x29   : > { %193 = vst.msk [vmem:[#allocation2 + $0xf0] sm:$0xff] %vm161_vm0, %v3591_v3  ;;  %194 = vst.msk [vmem:[#allocation2 + $0xf8] sm:$0xff] %vm161_vm0, %v3591_v3  ;;  %v240_v24 = vld [vmem:[%s3689_s6 + $0xb8] sm:$0xff]  ;;  %v241_v25 = vld [vmem:[%s3689_s6 + $0xc0] sm:$0xff] }
  0x2a   : > { %196 = vst.msk [vmem:[#allocation2 + $0x108] sm:$0xff] %vm161_vm0, %v3591_v3  ;;  %197 = vst.msk [vmem:[#allocation2 + $0x110] sm:$0xff] %vm161_vm0, %v3591_v3  ;;  %v242_v26 = vld [vmem:[%s3689_s6 + $0xc8] sm:$0xff]  ;;  %v243_v27 = vld [vmem:[%s3689_s6 + $0xd0] sm:$0xff] }
  0x2b   : > { %199 = vst.msk [vmem:[#allocation2 + $0x120] sm:$0xff] %vm161_vm0, %v3591_v3  ;;  %200 = vst.msk [vmem:[#allocation2 + $0x128] sm:$0xff] %vm161_vm0, %v3591_v3  ;;  %v244_v28 = vld [vmem:[%s3689_s6 + $0xd8] sm:$0xff]  ;;  %v245_v29 = vld [vmem:[%s3689_s6 + $0xe0] sm:$0xff] }
  0x2c   : > { %202 = vst.msk [vmem:[#allocation2 + $0x138] sm:$0xff] %vm161_vm0, %v3591_v3  ;;  %203 = vst.msk [vmem:[#allocation2 + $0x140] sm:$0xff] %vm161_vm0, %v3591_v3  ;;  %v246_v30 = vld [vmem:[%s3689_s6 + $0xe8] sm:$0xff]  ;;  %v247_v31 = vld [vmem:[%s3689_s6 + $0xf0] sm:$0xff] }
  0x2d   : > { %205 = vst.msk [vmem:[#allocation2 + $0x150] sm:$0xff] %vm161_vm0, %v3591_v3  ;;  %206 = vst.msk [vmem:[#allocation2 + $0x158] sm:$0xff] %vm161_vm0, %v3591_v3  ;;  %v248_v32 = vld [vmem:[%s3689_s6 + $0xf8] sm:$0xff] }
  0x2e   : > { %208 = vst.msk [vmem:[#allocation2 + $0x168] sm:$0xff] %vm161_vm0, %v3591_v3  ;;  %209 = vst.msk [vmem:[#allocation2 + $0x170] sm:$0xff] %vm161_vm0, %v3591_v3 }
  0x2f   : > { %211 = vst.msk [vmem:[#allocation2 + $0x180] sm:$0xff] %vm161_vm0, %v3591_v3  ;;  %212 = vst.msk [vmem:[#allocation2 + $0x188] sm:$0xff] %vm161_vm0, %v3591_v3 }
  0x30   : > { %214 = vst.msk [vmem:[#allocation2 + $0x198] sm:$0xff] %vm161_vm0, %v3591_v3  ;;  %215 = vst.msk [vmem:[#allocation2 + $0x1a0] sm:$0xff] %vm161_vm0, %v3591_v3 }
  0x31   : > { %168 = vst.msk [vmem:[#allocation2 + $0x28] sm:$0x3] %vm164_vm1, %v3591_v3  ;;  %165 = vst.msk [vmem:[#allocation2 + $0x10] sm:$0x3] %vm164_vm1, %v3591_v3 }
  0x32   : > { %171 = vst.msk [vmem:[#allocation2 + $0x40] sm:$0x3] %vm164_vm1, %v3591_v3  ;;  %174 = vst.msk [vmem:[#allocation2 + $0x58] sm:$0x3] %vm164_vm1, %v3591_v3 }
  0x33   : > { %177 = vst.msk [vmem:[#allocation2 + $0x70] sm:$0x3] %vm164_vm1, %v3591_v3  ;;  %180 = vst.msk [vmem:[#allocation2 + $0x88] sm:$0x3] %vm164_vm1, %v3591_v3 }
  0x34   : > { %183 = vst.msk [vmem:[#allocation2 + $0xa0] sm:$0x3] %vm164_vm1, %v3591_v3  ;;  %186 = vst.msk [vmem:[#allocation2 + $0xb8] sm:$0x3] %vm164_vm1, %v3591_v3 }
  0x35   : > { %189 = vst.msk [vmem:[#allocation2 + $0xd0] sm:$0x3] %vm164_vm1, %v3591_v3  ;;  %192 = vst.msk [vmem:[#allocation2 + $0xe8] sm:$0x3] %vm164_vm1, %v3591_v3 }
  0x36   : > { %195 = vst.msk [vmem:[#allocation2 + $0x100] sm:$0x3] %vm164_vm1, %v3591_v3  ;;  %198 = vst.msk [vmem:[#allocation2 + $0x118] sm:$0x3] %vm164_vm1, %v3591_v3 }
  0x37   : > { %201 = vst.msk [vmem:[#allocation2 + $0x130] sm:$0x3] %vm164_vm1, %v3591_v3  ;;  %204 = vst.msk [vmem:[#allocation2 + $0x148] sm:$0x3] %vm164_vm1, %v3591_v3 }
  0x38   : > { %207 = vst.msk [vmem:[#allocation2 + $0x160] sm:$0x3] %vm164_vm1, %v3591_v3  ;;  %210 = vst.msk [vmem:[#allocation2 + $0x178] sm:$0x3] %vm164_vm1, %v3591_v3 }
  0x39   : > { %213 = vst.msk [vmem:[#allocation2 + $0x190] sm:$0x3] %vm164_vm1, %v3591_v3  ;;  %216 = vst.msk [vmem:[#allocation2 + $0x1a8] sm:$0x3] %vm164_vm1, %v3591_v3 }
  0x3a   : > { %250 = vst.msk [vmem:[#allocation2 + $0x19] sm:$0xff] %vm161_vm0, %v217_v0  ;;  %251 = vst.msk [vmem:[#allocation2 + $0x21] sm:$0xff] %vm161_vm0, %v218_v1 }
  0x3b   : > { %252 = vst.msk [vmem:[#allocation2 + $0x31] sm:$0xff] %vm161_vm0, %v219_v2  ;;  %253 = vst.msk [vmem:[#allocation2 + $0x39] sm:$0xff] %vm161_vm0, %v220_v4 }
  0x3c   : > { %254 = vst.msk [vmem:[#allocation2 + $0x49] sm:$0xff] %vm161_vm0, %v221_v5  ;;  %255 = vst.msk [vmem:[#allocation2 + $0x51] sm:$0xff] %vm161_vm0, %v222_v6 }
  0x3d   : > { %256 = vst.msk [vmem:[#allocation2 + $0x61] sm:$0xff] %vm161_vm0, %v223_v7  ;;  %257 = vst.msk [vmem:[#allocation2 + $0x69] sm:$0xff] %vm161_vm0, %v224_v8 }
  0x3e   : > { %258 = vst.msk [vmem:[#allocation2 + $0x79] sm:$0xff] %vm161_vm0, %v225_v9  ;;  %259 = vst.msk [vmem:[#allocation2 + $0x81] sm:$0xff] %vm161_vm0, %v226_v10 }
  0x3f   : > { %260 = vst.msk [vmem:[#allocation2 + $0x91] sm:$0xff] %vm161_vm0, %v227_v11  ;;  %261 = vst.msk [vmem:[#allocation2 + $0x99] sm:$0xff] %vm161_vm0, %v228_v12 }
  0x40   : > { %262 = vst.msk [vmem:[#allocation2 + $0xa9] sm:$0xff] %vm161_vm0, %v229_v13  ;;  %263 = vst.msk [vmem:[#allocation2 + $0xb1] sm:$0xff] %vm161_vm0, %v230_v14 }
  0x41   : > { %264 = vst.msk [vmem:[#allocation2 + $0xc1] sm:$0xff] %vm161_vm0, %v231_v15  ;;  %265 = vst.msk [vmem:[#allocation2 + $0xc9] sm:$0xff] %vm161_vm0, %v232_v16 }
  0x42   : > { %266 = vst.msk [vmem:[#allocation2 + $0xd9] sm:$0xff] %vm161_vm0, %v233_v17  ;;  %267 = vst.msk [vmem:[#allocation2 + $0xe1] sm:$0xff] %vm161_vm0, %v234_v18 }
  0x43   : > { %268 = vst.msk [vmem:[#allocation2 + $0xf1] sm:$0xff] %vm161_vm0, %v235_v19  ;;  %269 = vst.msk [vmem:[#allocation2 + $0xf9] sm:$0xff] %vm161_vm0, %v236_v20 }
  0x44   : > { %270 = vst.msk [vmem:[#allocation2 + $0x109] sm:$0xff] %vm161_vm0, %v237_v21  ;;  %271 = vst.msk [vmem:[#allocation2 + $0x111] sm:$0xff] %vm161_vm0, %v238_v22 }
  0x45   : > { %272 = vst.msk [vmem:[#allocation2 + $0x121] sm:$0xff] %vm161_vm0, %v239_v23  ;;  %273 = vst.msk [vmem:[#allocation2 + $0x129] sm:$0xff] %vm161_vm0, %v240_v24 }
  0x46   : > { %274 = vst.msk [vmem:[#allocation2 + $0x139] sm:$0xff] %vm161_vm0, %v241_v25  ;;  %275 = vst.msk [vmem:[#allocation2 + $0x141] sm:$0xff] %vm161_vm0, %v242_v26 }
  0x47   : > { %276 = vst.msk [vmem:[#allocation2 + $0x151] sm:$0xff] %vm161_vm0, %v243_v27  ;;  %277 = vst.msk [vmem:[#allocation2 + $0x159] sm:$0xff] %vm161_vm0, %v244_v28 }
  0x48   : > { %278 = vst.msk [vmem:[#allocation2 + $0x169] sm:$0xff] %vm161_vm0, %v245_v29  ;;  %279 = vst.msk [vmem:[#allocation2 + $0x171] sm:$0xff] %vm161_vm0, %v246_v30 }
  0x49   : > { %280 = vst.msk [vmem:[#allocation2 + $0x181] sm:$0xff] %vm161_vm0, %v247_v31  ;;  %281 = vst.msk [vmem:[#allocation2 + $0x189] sm:$0xff] %vm161_vm0, %v248_v32 }
  0x4a PF: > { %v301_v33 = vld [vmem:[%s4551_s1] sm:$0xf]  ;;  %vm351_vm2 = vcmask 1043456   ;;  %s2763_s18 = smul.u32 192, %s3573_s12  ;;  %vm302_vm3 = vcmask 31744   ;;  %s3028_s30 = sshll.u32 %s3577_s13, 5 }
  0x4b   : > { %3421 = vmatprep.subr.msk.mxu1 %vm351_vm2, %v301_v33  ;;  %3187 = vmatprep.subr.msk.mxu0 %vm351_vm2, %v301_v33  ;;  %v2781_v34 = vld [vmem:[%s4551_s1 + $0x4] sm:$0xf]  ;;  %v2799_v35 = vld [vmem:[%s4551_s1 + $0x8] sm:$0xf]  ;;  %v2835_v42 = vld [vmem:[%s4551_s1 + $0xc] sm:$0xf] }
  0x4c   : > { %3422 = vmatpush3.msk.msra.mxu1 %vm351_vm2, %v301_v33  ;;  %3188 = vmatpush3.msk.msra.mxu0 %vm351_vm2, %v301_v33  ;;  %s3826_s29 = scalar_lea.vmem [#allocation2], %s2763_s18  ;;  %v2869_v43 = vld [vmem:[%s4551_s1 + $0x10] sm:$0xf]  ;;  %v3931_v60 = vld [vmem:[%s4551_s1 + $0x14] sm:$0xf]  ;;  %s2667_s13 = sshll.u32 %s3691_s7, 4  ;;  %s4493_s13 = int_to_ptr.vmem [resolvable:$true] %s2667_s13 }
  0x4d   : > { %3213 = vmatprep.subr.msk.mxu1 %vm351_vm2, %v2781_v34  ;;  %3239 = vmatprep.subr.msk.mxu0 %vm351_vm2, %v2799_v35  ;;  %v3936_v61 = vld [vmem:[%s4551_s1 + $0x18] sm:$0xf]  ;;  %v2973_v24 = vld [vmem:[%s4551_s1 + $0x1c] sm:$0xf]  ;;  %v3007_v25 = vld [vmem:[%s4551_s1 + $0x20] sm:$0xf] }
  0x4e   : > { %s4499_s8 = scalar_lea.sflag [#allocation5], %s148_s28  ;;  %s3497_s17 = scalar_lea.vmem %s4493_s13, 2048 }
  0x4f   : > { %p3498_p0 = scmp.ne.s32.totalorder %s4493_s13, %s3497_s17  ;;  %s3592_s18 = smov [#allocation4]  }
  0x50   : > { %v285_v36 = vld [vmem:[%s3826_s29] sm:$0xff]  ;;  %v286_v38 = vld [vmem:[%s3826_s29 + $0x8] sm:$0xff]  ;;  %v3842_v40 = vld [vmem:[%s3826_s29 + $0x18] sm:$0xff]  ;;  %s3501_s21 = sshll.u32 %s3592_s18, 4  ;;  %s3502_s21 = int_to_ptr.vmem [resolvable:$false] %s3501_s21 }
  0x51   : > { %v3830_v37 = vld [vmem:[%s3826_s29 + $0x60] sm:$0xff]  ;;  %3189 = vmatprep.mubr.msk.f32.mxu0 %vm302_vm3, %v285_v36  ;;  %v3839_v39 = vld [vmem:[%s3826_s29 + $0x68] sm:$0xff]  ;;  %v3845_v41 = vld [vmem:[%s3826_s29 + $0x78] sm:$0xff]  ;;  %p3499_p1 = pnand %p3498_p0, %p3661_p3  ;;  %s3503_s24 = scalar_lea.vmem %s3502_s21, 4096 }
  0x52   : > { %3201 = vmatprep.mubr.msk.f32.mxu1 %vm302_vm3, %v3830_v37  ;;  %3190 = vmatmul.mubr.msk.f32.vlgmr.msra.gmra.mxu0 %vm302_vm3, %v286_v38  ;;  %v3859_v44 = vld [vmem:[%s3826_s29 + $0x20] sm:$0xff]  ;;  %v3869_v46 = vld [vmem:[%s3826_s29 + $0x30] sm:$0xff]  ;;  %v3885_v48 = vld [vmem:[%s3826_s29 + $0x38] sm:$0xff]  ;;  %p3504_p4 = scmp.lt.s32.totalorder %s4493_s13, %s3502_s21  ;;  %p3505_p5 = scmp.lt.s32.totalorder %s3503_s24, %s3497_s17 }
  0x53   : > { %3202 = vmatmul.mubr.msk.f32.vlgmr.msra.gmra.mxu1 %vm302_vm3, %v3839_v39  ;;  %3240 = vmatpush3.msk.msra.mxu0 %vm351_vm2, %v2799_v35  ;;  %v3862_v45 = vld [vmem:[%s3826_s29 + $0x80] sm:$0xff]  ;;  %v3872_v47 = vld [vmem:[%s3826_s29 + $0x90] sm:$0xff]  ;;  %v3888_v49 = vld [vmem:[%s3826_s29 + $0x98] sm:$0xff]  ;;  %p3500_p2 = pneg %p3499_p1 }
  0x54   : > { %3214 = vmatpush3.msk.msra.mxu1 %vm351_vm2, %v2781_v34  ;;  %3192 = vmatprep.mubr.msk.f32.mxu0 %vm302_vm3, %v3842_v40  ;;  %v3891_v50 = vld [vmem:[%s3826_s29 + $0x48] sm:$0xff]  ;;  %v3905_v52 = vld [vmem:[%s3826_s29 + $0x50] sm:$0xff]  ;;  %v3921_v58 = vld [vmem:[%s3826_s29 + $0x19] sm:$0xff]  ;;  %p3506_p6 = por %p3505_p5, %p3504_p4 }
  0x55   : > { %3204 = vmatprep.mubr.msk.f32.mxu1 %vm302_vm3, %v3845_v41  ;;  %3265 = vmatprep.subr.msk.mxu1 %vm351_vm2, %v2835_v42  ;;  %v3894_v51 = vld [vmem:[%s3826_s29 + $0xa8] sm:$0xff]  ;;  %v3908_v53 = vld [vmem:[%s3826_s29 + $0xb0] sm:$0xff]  ;;  %v3924_v59 = vld [vmem:[%s3826_s29 + $0x1a] sm:$0xff] }
  0x56   : > { %3291 = vmatprep.subr.msk.mxu0 %vm351_vm2, %v2869_v43  ;;  %3193 = vmatmul.mubr.msk.f32.gmra.mxu0 %vm302_vm3, %v3859_v44  ;;  %v516_v54 = vld [vmem:[%s3826_s29 + $0x1] sm:$0xff]  ;;  %v517_v56 = vld [vmem:[%s3826_s29 + $0x9] sm:$0xff]  ;;  %v3949_v0 = vld [vmem:[%s3826_s29 + $0x31] sm:$0xff]  ;;  %p3507_p7 = pnand %p3506_p6, %p3500_p2 }
  0x57   : > { %3205 = vmatmul.mubr.msk.f32.gmra.mxu1 %vm302_vm3, %v3862_v45  ;;  %3195 = vmatprep.mubr.msk.f32.mxu0 %vm302_vm3, %v3869_v46  ;;  %v778_v55 = vld [vmem:[%s3826_s29 + $0x2] sm:$0xff]  ;;  %v779_v57 = vld [vmem:[%s3826_s29 + $0xa] sm:$0xff]  ;;  %v3952_v1 = vld [vmem:[%s3826_s29 + $0x32] sm:$0xff] }
  0x58   : > { %3207 = vmatprep.mubr.msk.f32.mxu1 %vm302_vm3, %v3872_v47  ;;  %v519_v62 = vld [vmem:[%s3826_s29 + $0x21] sm:$0xff]  ;;  %v3966_v2 = vld [vmem:[%s3826_s29 + $0x39] sm:$0xff]  ;;  %v3972_v4 = vld [vmem:[%s3826_s29 + $0x49] sm:$0xff] }
  0x59   : > { %v3942_v63 = vld [vmem:[%s3826_s29 + $0x22] sm:$0xff]  ;;  %v3969_v3 = vld [vmem:[%s3826_s29 + $0x3a] sm:$0xff]  ;;  %v3975_v5 = vld [vmem:[%s3826_s29 + $0x4a] sm:$0xff] }
  0x5a   : > { %3196 = vmatmul.mubr.msk.f32.gmra.mxu0 %vm302_vm3, %v3885_v48  ;;  %v3986_v6 = vld [vmem:[%s3826_s29 + $0x51] sm:$0xff]  ;;  %v3992_v8 = vld [vmem:[%s3826_s29 + $0x61] sm:$0xff]  ;;  %v4006_v10 = vld [vmem:[%s3826_s29 + $0x69] sm:$0xff] }
  0x5b   : > { %3208 = vmatmul.mubr.msk.f32.gmra.mxu1 %vm302_vm3, %v3888_v49  ;;  %3198 = vmatprep.mubr.msk.f32.mxu0 %vm302_vm3, %v3891_v50  ;;  %v3989_v7 = vld [vmem:[%s3826_s29 + $0x52] sm:$0xff]  ;;  %v3995_v9 = vld [vmem:[%s3826_s29 + $0x62] sm:$0xff]  ;;  %v4009_v11 = vld [vmem:[%s3826_s29 + $0x6a] sm:$0xff] }
  0x5c   : > { %3210 = vmatprep.mubr.msk.f32.mxu1 %vm302_vm3, %v3894_v51  ;;  %v4012_v12 = vld [vmem:[%s3826_s29 + $0x79] sm:$0xff]  ;;  %v4026_v14 = vld [vmem:[%s3826_s29 + $0x81] sm:$0xff]  ;;  %v4032_v16 = vld [vmem:[%s3826_s29 + $0x91] sm:$0xff] }
  0x5d   : > { %v4015_v13 = vld [vmem:[%s3826_s29 + $0x7a] sm:$0xff]  ;;  %v4029_v15 = vld [vmem:[%s3826_s29 + $0x82] sm:$0xff]  ;;  %v4035_v17 = vld [vmem:[%s3826_s29 + $0x92] sm:$0xff] }
  0x5e   : > { %3199 = vmatmul.mubr.msk.f32.gmra.mxu0 %vm302_vm3, %v3905_v52  ;;  %v4046_v18 = vld [vmem:[%s3826_s29 + $0x99] sm:$0xff]  ;;  %v4052_v20 = vld [vmem:[%s3826_s29 + $0xa9] sm:$0xff]  ;;  %v4066_v22 = vld [vmem:[%s3826_s29 + $0xb1] sm:$0xff] }
  0x5f   : > { %3211 = vmatmul.mubr.msk.f32.gmra.mxu1 %vm302_vm3, %v3908_v53  ;;  %3241 = vmatprep.mubr.msk.f32.mxu0 %vm302_vm3, %v778_v55  ;;  %v4049_v19 = vld [vmem:[%s3826_s29 + $0x9a] sm:$0xff]  ;;  %v4055_v21 = vld [vmem:[%s3826_s29 + $0xaa] sm:$0xff]  ;;  %v4069_v23 = vld [vmem:[%s3826_s29 + $0xb2] sm:$0xff] }
  0x60   : > { %3215 = vmatprep.mubr.msk.f32.mxu1 %vm302_vm3, %v516_v54  ;;  %v2833_v26 = vld [vmem:[%s3826_s29 + $0xc0] sm:$0xff]  ;;  %v2834_v28 = vld [vmem:[%s3826_s29 + $0xc8] sm:$0xff]  ;;  %v2937_v31 = vld [vmem:[%s3826_s29 + $0xd8] sm:$0xff] }
  0x61   : > { %v4140_v27 = vld [vmem:[%s3826_s29 + $0xc1] sm:$0xff]  ;;  %v4151_v29 = vld [vmem:[%s3826_s29 + $0xc9] sm:$0xff]  ;;  %v2971_v34 = vld [vmem:[%s3826_s29 + $0xd9] sm:$0xff] }
  0x62   : > { %3242 = vmatmul.mubr.msk.f32.vlgmr.msra.gmra.mxu0 %vm302_vm3, %v779_v57  ;;  %v2901_v30 = vld [vmem:[%s3826_s29 + $0xc2] sm:$0xff]  ;;  %v2902_v32 = vld [vmem:[%s3826_s29 + $0xca] sm:$0xff]  ;;  %v3005_v35 = vld [vmem:[%s3826_s29 + $0xda] sm:$0xff] }
  0x63   : > { %3216 = vmatmul.mubr.msk.f32.vlgmr.msra.gmra.mxu1 %vm302_vm3, %v517_v56  ;;  %3292 = vmatpush3.msk.msra.mxu0 %vm351_vm2, %v2869_v43  ;;  %v2938_v33 = vld [vmem:[%s3826_s29 + $0xe0] sm:$0xff] }
  0x64   : > { %3266 = vmatpush3.msk.msra.mxu1 %vm351_vm2, %v2835_v42  ;;  %3218 = vmatprep.mubr.msk.f32.mxu1 %vm302_vm3, %v3921_v58  ;;  %v2972_v36 = vld [vmem:[%s3826_s29 + $0xe1] sm:$0xff] }
  0x65   : > { %3244 = vmatprep.mubr.msk.f32.mxu0 %vm302_vm3, %v3924_v59  ;;  %3317 = vmatprep.subr.msk.mxu1 %vm351_vm2, %v3931_v60 }
  0x66   : > { %3343 = vmatprep.subr.msk.mxu0 %vm351_vm2, %v3936_v61  ;;  %3245 = vmatmul.mubr.msk.f32.gmra.mxu0 %vm302_vm3, %v3942_v63 }
  0x67   : > { %3219 = vmatmul.mubr.msk.f32.gmra.mxu1 %vm302_vm3, %v519_v62  ;;  %3247 = vmatprep.mubr.msk.f32.mxu0 %vm302_vm3, %v3952_v1 }
  0x68   : > { %3221 = vmatprep.mubr.msk.f32.mxu1 %vm302_vm3, %v3949_v0 }
  0x6a   : > { %3248 = vmatmul.mubr.msk.f32.gmra.mxu0 %vm302_vm3, %v3969_v3 }
  0x6b   : > { %3222 = vmatmul.mubr.msk.f32.gmra.mxu1 %vm302_vm3, %v3966_v2  ;;  %3250 = vmatprep.mubr.msk.f32.mxu0 %vm302_vm3, %v3975_v5 }
  0x6c   : > { %3224 = vmatprep.mubr.msk.f32.mxu1 %vm302_vm3, %v3972_v4 }
  0x6e   : > { %3251 = vmatmul.mubr.msk.f32.gmra.mxu0 %vm302_vm3, %v3989_v7 }
  0x6f   : > { %3225 = vmatmul.mubr.msk.f32.gmra.mxu1 %vm302_vm3, %v3986_v6  ;;  %3253 = vmatprep.mubr.msk.f32.mxu0 %vm302_vm3, %v3995_v9 }
  0x70   : > { %3227 = vmatprep.mubr.msk.f32.mxu1 %vm302_vm3, %v3992_v8 }
  0x72   : > { %3254 = vmatmul.mubr.msk.f32.gmra.mxu0 %vm302_vm3, %v4009_v11 }
  0x73   : > { %3228 = vmatmul.mubr.msk.f32.gmra.mxu1 %vm302_vm3, %v4006_v10  ;;  %3256 = vmatprep.mubr.msk.f32.mxu0 %vm302_vm3, %v4015_v13 }
  0x74   : > { %3230 = vmatprep.mubr.msk.f32.mxu1 %vm302_vm3, %v4012_v12 }
  0x76   : > { %3257 = vmatmul.mubr.msk.f32.gmra.mxu0 %vm302_vm3, %v4029_v15 }
  0x77   : > { %3231 = vmatmul.mubr.msk.f32.gmra.mxu1 %vm302_vm3, %v4026_v14  ;;  %3259 = vmatprep.mubr.msk.f32.mxu0 %vm302_vm3, %v4035_v17 }
  0x78   : > { %3233 = vmatprep.mubr.msk.f32.mxu1 %vm302_vm3, %v4032_v16 }
  0x7a   : > { %3260 = vmatmul.mubr.msk.f32.gmra.mxu0 %vm302_vm3, %v4049_v19 }
  0x7b   : > { %3234 = vmatmul.mubr.msk.f32.gmra.mxu1 %vm302_vm3, %v4046_v18  ;;  %3262 = vmatprep.mubr.msk.f32.mxu0 %vm302_vm3, %v4055_v21 }
  0x7c   : > { %3236 = vmatprep.mubr.msk.f32.mxu1 %vm302_vm3, %v4052_v20 }
  0x7e   : > { %3263 = vmatmul.mubr.msk.f32.gmra.mxu0 %vm302_vm3, %v4069_v23 }
  0x7f   : > { %3237 = vmatmul.mubr.msk.f32.gmra.mxu1 %vm302_vm3, %v4066_v22  ;;  %3293 = vmatprep.mubr.msk.f32.mxu0 %vm302_vm3, %v3921_v58 }
  0x80   : > { %3267 = vmatprep.mubr.msk.f32.mxu1 %vm302_vm3, %v3842_v40 }
  0x82   : > { %3294 = vmatmul.mubr.msk.f32.vlgmr.msra.gmra.mxu0 %vm302_vm3, %v519_v62 }
  0x83   : > { %3268 = vmatmul.mubr.msk.f32.vlgmr.msra.gmra.mxu1 %vm302_vm3, %v3859_v44  ;;  %3344 = vmatpush3.msk.msra.mxu0 %vm351_vm2, %v3936_v61 }
  0x84   : > { %3318 = vmatpush3.msk.msra.mxu1 %vm351_vm2, %v3931_v60  ;;  %3270 = vmatprep.mubr.msk.f32.mxu1 %vm302_vm3, %v3869_v46 }
  0x85   : > { %3296 = vmatprep.mubr.msk.f32.mxu0 %vm302_vm3, %v3949_v0  ;;  %3369 = vmatprep.subr.msk.mxu1 %vm351_vm2, %v2973_v24 }
  0x86   : > { %3395 = vmatprep.subr.msk.mxu0 %vm351_vm2, %v3007_v25  ;;  %3297 = vmatmul.mubr.msk.f32.gmra.mxu0 %vm302_vm3, %v3966_v2 }
  0x87   : > { %3271 = vmatmul.mubr.msk.f32.gmra.mxu1 %vm302_vm3, %v3885_v48  ;;  %3299 = vmatprep.mubr.msk.f32.mxu0 %vm302_vm3, %v3972_v4 }
  0x88   : > { %3273 = vmatprep.mubr.msk.f32.mxu1 %vm302_vm3, %v3891_v50 }
  0x8a   : > { %3300 = vmatmul.mubr.msk.f32.gmra.mxu0 %vm302_vm3, %v3986_v6 }
  0x8b   : > { %3274 = vmatmul.mubr.msk.f32.gmra.mxu1 %vm302_vm3, %v3905_v52  ;;  %3302 = vmatprep.mubr.msk.f32.mxu0 %vm302_vm3, %v3992_v8 }
  0x8c   : > { %3276 = vmatprep.mubr.msk.f32.mxu1 %vm302_vm3, %v3830_v37 }
  0x8e   : > { %3303 = vmatmul.mubr.msk.f32.gmra.mxu0 %vm302_vm3, %v4006_v10 }
  0x8f   : > { %3277 = vmatmul.mubr.msk.f32.gmra.mxu1 %vm302_vm3, %v3839_v39  ;;  %3305 = vmatprep.mubr.msk.f32.mxu0 %vm302_vm3, %v4012_v12 }
  0x90   : > { %3279 = vmatprep.mubr.msk.f32.mxu1 %vm302_vm3, %v3845_v41 }
  0x92   : > { %3306 = vmatmul.mubr.msk.f32.gmra.mxu0 %vm302_vm3, %v4026_v14 }
  0x93   : > { %3280 = vmatmul.mubr.msk.f32.gmra.mxu1 %vm302_vm3, %v3862_v45  ;;  %3308 = vmatprep.mubr.msk.f32.mxu0 %vm302_vm3, %v4032_v16 }
  0x94   : > { %3282 = vmatprep.mubr.msk.f32.mxu1 %vm302_vm3, %v3872_v47 }
  0x96   : > { %3309 = vmatmul.mubr.msk.f32.gmra.mxu0 %vm302_vm3, %v4046_v18 }
  0x97   : > { %3283 = vmatmul.mubr.msk.f32.gmra.mxu1 %vm302_vm3, %v3888_v49  ;;  %3311 = vmatprep.mubr.msk.f32.mxu0 %vm302_vm3, %v4052_v20 }
  0x98   : > { %3285 = vmatprep.mubr.msk.f32.mxu1 %vm302_vm3, %v3894_v51 }
  0x9a   : > { %3312 = vmatmul.mubr.msk.f32.gmra.mxu0 %vm302_vm3, %v4066_v22 }
  0x9b   : > { %3286 = vmatmul.mubr.msk.f32.gmra.mxu1 %vm302_vm3, %v3908_v53  ;;  %3314 = vmatprep.mubr.msk.f32.mxu0 %vm302_vm3, %v4140_v27 }
  0x9c   : > { %3288 = vmatprep.mubr.msk.f32.mxu1 %vm302_vm3, %v2833_v26 }
  0x9e   : > { %3315 = vmatmul.mubr.msk.f32.gmra.mxu0 %vm302_vm3, %v4151_v29 }
  0x9f   : > { %3289 = vmatmul.mubr.msk.f32.gmra.mxu1 %vm302_vm3, %v2834_v28  ;;  %3345 = vmatprep.mubr.msk.f32.mxu0 %vm302_vm3, %v3869_v46 }
  0xa0   : > { %3319 = vmatprep.mubr.msk.f32.mxu1 %vm302_vm3, %v3924_v59 }
  0xa2   : > { %3346 = vmatmul.mubr.msk.f32.vlgmr.msra.gmra.mxu0 %vm302_vm3, %v3885_v48 }
  0xa3   : > { %3320 = vmatmul.mubr.msk.f32.vlgmr.msra.gmra.mxu1 %vm302_vm3, %v3942_v63  ;;  %3396 = vmatpush3.msk.msra.mxu0 %vm351_vm2, %v3007_v25 }
  0xa4   : > { %3370 = vmatpush3.msk.msra.mxu1 %vm351_vm2, %v2973_v24  ;;  %3322 = vmatprep.mubr.msk.f32.mxu1 %vm302_vm3, %v3952_v1 }
  0xa5   : > { %3348 = vmatprep.mubr.msk.f32.mxu0 %vm302_vm3, %v3891_v50 }
  0xa6   : > { %3349 = vmatmul.mubr.msk.f32.gmra.mxu0 %vm302_vm3, %v3905_v52 }
  0xa7   : > { %3323 = vmatmul.mubr.msk.f32.gmra.mxu1 %vm302_vm3, %v3969_v3  ;;  %3351 = vmatprep.mubr.msk.f32.mxu0 %vm302_vm3, %v3830_v37  ;;  %v3006_v37 = vld [vmem:[%s3826_s29 + $0xe2] sm:$0xff]  ;;  %s3033_s29 = sshll.u32 %s3573_s12, 4 }
  0xa8   : > { %3325 = vmatprep.mubr.msk.f32.mxu1 %vm302_vm3, %v3975_v5  ;;  %s2664_s3 = sadd.s32 %s3033_s29, %s3028_s30 }
  0xa9   : > { %s3029_s12 = sshll.u32 %s2664_s3, 7 }
  0xaa   : > { %3352 = vmatmul.mubr.msk.f32.gmra.mxu0 %vm302_vm3, %v3839_v39  ;;  %s4491_s6 = scalar_lea.hbm %s4552_s2, %s3029_s12 }
  0xab   : > { %3326 = vmatmul.mubr.msk.f32.gmra.mxu1 %vm302_vm3, %v3989_v7  ;;  %3354 = vmatprep.mubr.msk.f32.mxu0 %vm302_vm3, %v3845_v41 }
  0xac   : > { %3328 = vmatprep.mubr.msk.f32.mxu1 %vm302_vm3, %v3995_v9 }
  0xae   : > { %3355 = vmatmul.mubr.msk.f32.gmra.mxu0 %vm302_vm3, %v3862_v45 }
  0xaf   : > { %3329 = vmatmul.mubr.msk.f32.gmra.mxu1 %vm302_vm3, %v4009_v11  ;;  %3357 = vmatprep.mubr.msk.f32.mxu0 %vm302_vm3, %v3872_v47 }
  0xb0   : > { %3331 = vmatprep.mubr.msk.f32.mxu1 %vm302_vm3, %v4015_v13 }
  0xb2   : > { %3358 = vmatmul.mubr.msk.f32.gmra.mxu0 %vm302_vm3, %v3888_v49 }
  0xb3   : > { %3332 = vmatmul.mubr.msk.f32.gmra.mxu1 %vm302_vm3, %v4029_v15  ;;  %3360 = vmatprep.mubr.msk.f32.mxu0 %vm302_vm3, %v3894_v51 }
  0xb4   : > { %3334 = vmatprep.mubr.msk.f32.mxu1 %vm302_vm3, %v4035_v17 }
  0xb6   : > { %3361 = vmatmul.mubr.msk.f32.gmra.mxu0 %vm302_vm3, %v3908_v53 }
  0xb7   : > { %3335 = vmatmul.mubr.msk.f32.gmra.mxu1 %vm302_vm3, %v4049_v19  ;;  %3363 = vmatprep.mubr.msk.f32.mxu0 %vm302_vm3, %v2833_v26 }
  0xb8   : > { %3337 = vmatprep.mubr.msk.f32.mxu1 %vm302_vm3, %v4055_v21 }
  0xba   : > { %3364 = vmatmul.mubr.msk.f32.gmra.mxu0 %vm302_vm3, %v2834_v28 }
  0xbb   : > { %3338 = vmatmul.mubr.msk.f32.gmra.mxu1 %vm302_vm3, %v4069_v23  ;;  %3366 = vmatprep.mubr.msk.f32.mxu0 %vm302_vm3, %v2937_v31 }
  0xbc   : > { %3340 = vmatprep.mubr.msk.f32.mxu1 %vm302_vm3, %v2901_v30 }
  0xbe   : > { %3367 = vmatmul.mubr.msk.f32.gmra.mxu0 %vm302_vm3, %v2938_v33 }
  0xbf   : > { %3341 = vmatmul.mubr.msk.f32.gmra.mxu1 %vm302_vm3, %v2902_v32  ;;  %3397 = vmatprep.mubr.msk.f32.mxu0 %vm302_vm3, %v3952_v1 }
  0xc0   : > { %3371 = vmatprep.mubr.msk.f32.mxu1 %vm302_vm3, %v3949_v0 }
  0xc2   : > { %3398 = vmatmul.mubr.msk.f32.vlgmr.msra.gmra.mxu0 %vm302_vm3, %v3969_v3 }
  0xc3   : > { %3372 = vmatmul.mubr.msk.f32.vlgmr.msra.gmra.mxu1 %vm302_vm3, %v3966_v2  ;;  %3400 = vmatprep.mubr.msk.f32.mxu0 %vm302_vm3, %v3975_v5 }
  0xc4   : > { %3374 = vmatprep.mubr.msk.f32.mxu1 %vm302_vm3, %v3972_v4 }
  0xc6   : > { %3401 = vmatmul.mubr.msk.f32.gmra.mxu0 %vm302_vm3, %v3989_v7 }
  0xc7   : > { %3375 = vmatmul.mubr.msk.f32.gmra.mxu1 %vm302_vm3, %v3986_v6  ;;  %3403 = vmatprep.mubr.msk.f32.mxu0 %vm302_vm3, %v3995_v9 }
  0xc8   : > { %3377 = vmatprep.mubr.msk.f32.mxu1 %vm302_vm3, %v3992_v8 }
  0xca   : > { %3404 = vmatmul.mubr.msk.f32.gmra.mxu0 %vm302_vm3, %v4009_v11 }
  0xcb   : > { %3378 = vmatmul.mubr.msk.f32.gmra.mxu1 %vm302_vm3, %v4006_v10  ;;  %3406 = vmatprep.mubr.msk.f32.mxu0 %vm302_vm3, %v4015_v13 }
  0xcc   : > { %3380 = vmatprep.mubr.msk.f32.mxu1 %vm302_vm3, %v4012_v12 }
  0xce   : > { %3407 = vmatmul.mubr.msk.f32.gmra.mxu0 %vm302_vm3, %v4029_v15 }
  0xcf   : > { %3381 = vmatmul.mubr.msk.f32.gmra.mxu1 %vm302_vm3, %v4026_v14  ;;  %3409 = vmatprep.mubr.msk.f32.mxu0 %vm302_vm3, %v4035_v17 }
  0xd0   : > { %3383 = vmatprep.mubr.msk.f32.mxu1 %vm302_vm3, %v4032_v16 }
  0xd2   : > { %3410 = vmatmul.mubr.msk.f32.gmra.mxu0 %vm302_vm3, %v4049_v19 }
  0xd3   : > { %3384 = vmatmul.mubr.msk.f32.gmra.mxu1 %vm302_vm3, %v4046_v18  ;;  %3412 = vmatprep.mubr.msk.f32.mxu0 %vm302_vm3, %v4055_v21 }
  0xd4   : > { %3386 = vmatprep.mubr.msk.f32.mxu1 %vm302_vm3, %v4052_v20 }
  0xd6   : > { %3413 = vmatmul.mubr.msk.f32.gmra.mxu0 %vm302_vm3, %v4069_v23 }
  0xd7   : > { %3387 = vmatmul.mubr.msk.f32.gmra.mxu1 %vm302_vm3, %v4066_v22  ;;  %3415 = vmatprep.mubr.msk.f32.mxu0 %vm302_vm3, %v2901_v30 }
  0xd8   : > { %3389 = vmatprep.mubr.msk.f32.mxu1 %vm302_vm3, %v4140_v27 }
  0xda   : > { %3416 = vmatmul.mubr.msk.f32.gmra.mxu0 %vm302_vm3, %v2902_v32 }
  0xdb   : > { %3390 = vmatmul.mubr.msk.f32.gmra.mxu1 %vm302_vm3, %v4151_v29  ;;  %3418 = vmatprep.mubr.msk.f32.mxu0 %vm302_vm3, %v3005_v35 }
  0xdc   : > { %3392 = vmatprep.mubr.msk.f32.mxu1 %vm302_vm3, %v2971_v34 }
  0xde   : > { %3419 = vmatmul.mubr.msk.f32.gmra.mxu0 %vm302_vm3, %v3006_v37 }
  0xdf   : > { %3393 = vmatmul.mubr.msk.f32.gmra.mxu1 %vm302_vm3, %v2972_v36 }
 0x112   : > { %v3191_v38 = vpop.f32.mrf.mxu0 }
 0x113   : > { %v3203_v39 = vpop.f32.mrf.mxu1 }
 0x114   : > { %v421_v40 = vpop.f32.mrf.mxu0 }
 0x115   : > { %v461_v41 = vpop.f32.mrf.mxu1 }
 0x116   : > { %v3194_v42 = vpop.f32.mrf.mxu0 }
 0x117   : > { %v3206_v43 = vpop.f32.mrf.mxu1 }
 0x118   : > { %v431_v44 = vpop.f32.mrf.mxu0 }
 0x119   : > { %v471_v45 = vpop.f32.mrf.mxu1 }
 0x11a   : > { %v3197_v46 = vpop.f32.mrf.mxu0 }
 0x11b   : > { %v3209_v47 = vpop.f32.mrf.mxu1 }
 0x11c   : > { %v441_v48 = vpop.f32.mrf.mxu0 }
 0x11d   : > { %v481_v49 = vpop.f32.mrf.mxu1 }
 0x11e   : > { %v3200_v50 = vpop.f32.mrf.mxu0 }
 0x11f   : > { %v3212_v51 = vpop.f32.mrf.mxu1 }
 0x120   : > { %v451_v52 = vpop.f32.mrf.mxu0 }
 0x121   : > { %v4282_v53 = vpop.f32.mrf.mxu1 }
 0x122   : > { %v3243_v55 = vpop.f32.mrf.mxu0 }
 0x123   : > { %v3217_v54 = vpop.f32.mrf.mxu1 }
 0x124   : > { %v747_v56 = vadd.f32 %v3217_v54, %v3191_v38  ;;  %v913_v58 = vpop.f32.mrf.mxu0 }
 0x125   : > { %v651_v57 = vpop.f32.mrf.mxu1 }
 0x126   : > { %v4284_v59 = vadd.f32 %v3243_v55, %v747_v56  ;;  %v746_v60 = vadd.f32 %v651_v57, %v421_v40  ;;  %v3246_v62 = vpop.f32.mrf.mxu0 }
 0x127   : > { %v3220_v61 = vpop.f32.mrf.mxu1 }
 0x128   : > { %v4286_v63 = vadd.f32 %v913_v58, %v746_v60  ;;  %v749_v0 = vadd.f32 %v3220_v61, %v3194_v42  ;;  %v923_v2 = vpop.f32.mrf.mxu0 }
 0x129   : > { %v661_v1 = vpop.f32.mrf.mxu1 }
 0x12a   : > { %v4288_v3 = vadd.f32 %v3246_v62, %v749_v0  ;;  %v748_v4 = vadd.f32 %v661_v1, %v431_v44  ;;  %v3249_v6 = vpop.f32.mrf.mxu0 }
 0x12b   : > { %v3223_v5 = vpop.f32.mrf.mxu1 }
 0x12c   : > { %v4290_v7 = vadd.f32 %v923_v2, %v748_v4  ;;  %v751_v8 = vadd.f32 %v3223_v5, %v3197_v46  ;;  %v933_v10 = vpop.f32.mrf.mxu0 }
 0x12d   : > { %v671_v9 = vpop.f32.mrf.mxu1 }
 0x12e   : > { %v4292_v11 = vadd.f32 %v3249_v6, %v751_v8  ;;  %v750_v12 = vadd.f32 %v671_v9, %v441_v48  ;;  %v3252_v14 = vpop.f32.mrf.mxu0 }
 0x12f   : > { %v3226_v13 = vpop.f32.mrf.mxu1 }
 0x130   : > { %v4294_v15 = vadd.f32 %v933_v10, %v750_v12  ;;  %v753_v16 = vadd.f32 %v3226_v13, %v3200_v50  ;;  %v943_v18 = vpop.f32.mrf.mxu0 }
 0x131   : > { %v681_v17 = vpop.f32.mrf.mxu1 }
 0x132   : > { %v4296_v19 = vadd.f32 %v3252_v14, %v753_v16  ;;  %v752_v20 = vadd.f32 %v681_v17, %v451_v52  ;;  %v3255_v22 = vpop.f32.mrf.mxu0 }
 0x133   : > { %v3229_v21 = vpop.f32.mrf.mxu1 }
 0x134   : > { %v4298_v23 = vadd.f32 %v943_v18, %v752_v20  ;;  %v755_v24 = vadd.f32 %v3229_v21, %v3203_v39  ;;  %v953_v26 = vpop.f32.mrf.mxu0 }
 0x135   : > { %v691_v25 = vpop.f32.mrf.mxu1 }
 0x136   : > { %v4300_v27 = vadd.f32 %v3255_v22, %v755_v24  ;;  %v754_v28 = vadd.f32 %v691_v25, %v461_v41  ;;  %v3258_v30 = vpop.f32.mrf.mxu0 }
 0x137   : > { %v3232_v29 = vpop.f32.mrf.mxu1 }
 0x138   : > { %v4302_v31 = vadd.f32 %v953_v26, %v754_v28  ;;  %v757_v32 = vadd.f32 %v3232_v29, %v3206_v43  ;;  %v963_v34 = vpop.f32.mrf.mxu0 }
 0x139   : > { %v701_v33 = vpop.f32.mrf.mxu1 }
 0x13a   : > { %v4304_v35 = vadd.f32 %v3258_v30, %v757_v32  ;;  %v756_v36 = vadd.f32 %v701_v33, %v471_v45  ;;  %v3261_v38 = vpop.f32.mrf.mxu0 }
 0x13b   : > { %v3235_v37 = vpop.f32.mrf.mxu1 }
 0x13c   : > { %v4306_v40 = vadd.f32 %v963_v34, %v756_v36  ;;  %v759_v39 = vadd.f32 %v3235_v37, %v3209_v47  ;;  %v973_v44 = vpop.f32.mrf.mxu0 }
 0x13d   : > { %v711_v42 = vpop.f32.mrf.mxu1 }
 0x13e   : > { %v4308_v46 = vadd.f32 %v3261_v38, %v759_v39  ;;  %v758_v41 = vadd.f32 %v711_v42, %v481_v49  ;;  %v3264_v50 = vpop.f32.mrf.mxu0 }
 0x13f   : > { %v3238_v48 = vpop.f32.mrf.mxu1 }
 0x140   : > { %v4310_v52 = vadd.f32 %v973_v44, %v758_v41  ;;  %v761_v43 = vadd.f32 %v3238_v48, %v3212_v51  ;;  %v983_v55 = vpop.f32.mrf.mxu0 }
 0x141   : > { %v721_v54 = vpop.f32.mrf.mxu1 }
 0x142   : > { %4555 = vst [vmem:[#allocation7_spill] sm:$0xff] %v4310_v52  ;;  %v4312_v56 = vadd.f32 %v3264_v50, %v761_v43  ;;  %v760_v45 = vadd.f32 %v721_v54, %v4282_v53  ;;  %v3295_v58 = vpop.f32.mrf.mxu0 }
 0x143   : > { %v3269_v57 = vpop.f32.mrf.mxu1 }
 0x144   : > { %4556 = vst [vmem:[#allocation8_spill] sm:$0xff] %v4312_v56  ;;  %v4315_v60 = vadd.f32 %v983_v55, %v760_v45  ;;  %v1440_v61 = vpop.f32.mrf.mxu0  ;;  %v1274_v56 = vadd.f32 %v3269_v57, %v4284_v59 }
 0x145   : > { %v1178_v47 = vpop.f32.mrf.mxu1 }
 0x146   : > { %4557 = vst [vmem:[#allocation9_spill] sm:$0xff] %v4315_v60  ;;  %v4317_v0 = vpop.f32.mrf.mxu0  ;;  %v1273_v52 = vadd.f32 %v1178_v47, %v4286_v63 }
 0x147   : > { %v3272_v62 = vpop.f32.mrf.mxu1 }
 0x148   : > { %v4319_v1 = vpop.f32.mrf.mxu0 }
 0x149   : > { %v1188_v49 = vpop.f32.mrf.mxu1 }
 0x14a   : > { %v4321_v51 = vpop.f32.mrf.mxu0  ;;  %v1275_v59 = vadd.f32 %v1188_v49, %v4290_v7 }
 0x14b   : > { %v3275_v2 = vpop.f32.mrf.mxu1 }
 0x14c   : > { %v4323_v5 = vpop.f32.mrf.mxu0  ;;  %v1278_v47 = vadd.f32 %v3275_v2, %v4292_v11 }
 0x14d   : > { %v1198_v4 = vpop.f32.mrf.mxu1 }
 0x14e   : > { %v4327_v53 = vpop.f32.mrf.mxu0 }
 0x14f   : > { %v4325_v6 = vpop.f32.mrf.mxu1 }
 0x150   : > { %v4331_v9 = vpop.f32.mrf.mxu0 }
 0x151   : > { %v4329_v8 = vpop.f32.mrf.mxu1 }
 0x152   : > { %v4335_v12 = vpop.f32.mrf.mxu0 }
 0x153   : > { %v4333_v10 = vpop.f32.mrf.mxu1 }
 0x154   : > { %v4339_v14 = vpop.f32.mrf.mxu0 }
 0x155   : > { %v4337_v13 = vpop.f32.mrf.mxu1 }
 0x156   : > { %v4343_v17 = vpop.f32.mrf.mxu0 }
 0x157   : > { %v4341_v16 = vpop.f32.mrf.mxu1 }
 0x158   : > { %v4347_v20 = vpop.f32.mrf.mxu0 }
 0x159   : > { %v4345_v18 = vpop.f32.mrf.mxu1  ;;  %4558 = vst [vmem:[#allocation10_spill] sm:$0xff] %v4347_v20 }
 0x15a   : > { %v4351_v22 = vpop.f32.mrf.mxu0 }
 0x15b   : > { %v4349_v21 = vpop.f32.mrf.mxu1  ;;  %4559 = vst [vmem:[#allocation11_spill] sm:$0xff] %v4351_v22 }
 0x15c   : > { %v4355_v25 = vpop.f32.mrf.mxu0 }
 0x15d   : > { %v4353_v24 = vpop.f32.mrf.mxu1  ;;  %4561 = vst [vmem:[#allocation13_spill] sm:$0xff] %v4355_v25 }
 0x15e   : > { %4560 = vst [vmem:[#allocation12_spill] sm:$0xff] %v4353_v24  ;;  %v4359_v28 = vpop.f32.mrf.mxu0 }
 0x15f   : > { %v4357_v26 = vpop.f32.mrf.mxu1  ;;  %4563 = vst [vmem:[#allocation15_spill] sm:$0xff] %v4359_v28 }
 0x160   : > { %4562 = vst [vmem:[#allocation14_spill] sm:$0xff] %v4357_v26  ;;  %v4363_v30 = vpop.f32.mrf.mxu0 }
 0x161   : > { %v4361_v29 = vpop.f32.mrf.mxu1  ;;  %4565 = vst [vmem:[#allocation17_spill] sm:$0xff] %v4363_v30 }
 0x162   : > { %4564 = vst [vmem:[#allocation16_spill] sm:$0xff] %v4361_v29  ;;  %v3347_v33 = vpop.f32.mrf.mxu0 }
 0x163   : > { %v3321_v32 = vpop.f32.mrf.mxu1 }
 0x164   : > { %v1967_v36 = vpop.f32.mrf.mxu0 }
 0x165   : > { %v1702_v34 = vpop.f32.mrf.mxu1 }
 0x166   : > { %v3350_v38 = vpop.f32.mrf.mxu0 }
 0x167   : > { %v3324_v37 = vpop.f32.mrf.mxu1 }
 0x168   : > { %v1977_v42 = vpop.f32.mrf.mxu0 }
 0x169   : > { %v1712_v39 = vpop.f32.mrf.mxu1 }
 0x16a   : > { %v4365_v41 = vpop.f32.mrf.mxu0 }
 0x16b   : > { %v3327_v44 = vpop.f32.mrf.mxu1 }
 0x16c   : > { %v4367_v50 = vpop.f32.mrf.mxu0 }
 0x16d   : > { %v1722_v48 = vpop.f32.mrf.mxu1 }
 0x16e   : > { %v4371_v54 = vpop.f32.mrf.mxu0 }
 0x16f   : > { %v4369_v43 = vpop.f32.mrf.mxu1 }
 0x170   : > { %v4375_v45 = vpop.f32.mrf.mxu0 }
 0x171   : > { %v4373_v55 = vpop.f32.mrf.mxu1  ;;  %4566 = vst [vmem:[#allocation18_spill] sm:$0xff] %v4375_v45 }
 0x172   : > { %v4379_v28 = vpop.f32.mrf.mxu0 }
 0x173   : > { %v4377_v30 = vpop.f32.mrf.mxu1  ;;  %4567 = vst [vmem:[#allocation19_spill] sm:$0xff] %v4379_v28  ;;  %v1536_v28 = vadd.f32 %v3295_v58, %v1274_v56  ;;  %v1277_v56 = vadd.f32 %v1198_v4, %v4294_v15  ;;  %v1279_v4 = vadd.f32 %v4329_v8, %v4298_v23  ;;  %v1281_v8 = vadd.f32 %v4337_v13, %v4302_v31 }
 0x174   : > { %v4383_v60 = vpop.f32.mrf.mxu0 }
 0x175   : > { %v4381_v29 = vpop.f32.mrf.mxu1  ;;  %4569 = vst [vmem:[#allocation21_spill] sm:$0xff] %v4383_v60  ;;  %v1798_v57 = vadd.f32 %v3321_v32, %v1536_v28  ;;  %v1539_v15 = vadd.f32 %v4323_v5, %v1277_v56  ;;  %v1541_v23 = vadd.f32 %v4331_v9, %v1279_v4  ;;  %v1283_v56 = vadd.f32 %v4345_v18, %v4306_v40 }
 0x176   : > { %4568 = vst [vmem:[#allocation20_spill] sm:$0xff] %v4381_v29  ;;  %v4387_v26 = vpop.f32.mrf.mxu0  ;;  %v1276_v29 = vadd.f32 %v3272_v62, %v4288_v3  ;;  %v1280_v62 = vadd.f32 %v4325_v6, %v4296_v19 }
 0x177   : > { %v4385_v25 = vpop.f32.mrf.mxu1  ;;  %4571 = vst [vmem:[#allocation23_spill] sm:$0xff] %v4387_v26  ;;  %v1535_v26 = vadd.f32 %v1440_v61, %v1273_v52  ;;  %v1537_v52 = vadd.f32 %v4319_v1, %v1275_v59  ;;  %v2063_v61 = vadd.f32 %v3347_v33, %v1798_v57  ;;  %v1803_v31 = vadd.f32 %v4373_v55, %v1541_v23 }
 0x178   : > { %4570 = vst [vmem:[#allocation22_spill] sm:$0xff] %v4385_v25  ;;  %v4392_v24 = vpop.f32.mrf.mxu0  ;;  %v1538_v63 = vadd.f32 %v4317_v0, %v1276_v29  ;;  %v1540_v0 = vadd.f32 %v4321_v51, %v1278_v47  ;;  %v1542_v19 = vadd.f32 %v4327_v53, %v1280_v62  ;;  %v1282_v51 = vadd.f32 %v4333_v10, %v4300_v27 }
 0x179   : > { %v4390_v22 = vpop.f32.mrf.mxu1  ;;  %4573 = vst [vmem:[#allocation25_spill] sm:$0xff] %v4392_v24  ;;  %v1799_v11 = vadd.f32 %v1712_v39, %v1537_v52 }
 0x17a   : > { %4572 = vst [vmem:[#allocation24_spill] sm:$0xff] %v4390_v22  ;;  %v4397_v45 = vpop.f32.mrf.mxu0  ;;  %v1800_v7 = vadd.f32 %v3324_v37, %v1538_v63  ;;  %v1802_v33 = vadd.f32 %v3327_v44, %v1540_v0  ;;  %v1804_v57 = vadd.f32 %v4369_v43, %v1542_v19  ;;  %v1543_v43 = vadd.f32 %v4339_v14, %v1281_v8  ;;  %v4583_v19 = vld [vmem:[#allocation8_spill] sm:$0xff] }
 0x17b   : > { %v4395_v20 = vpop.f32.mrf.mxu1  ;;  %4574 = vst [vmem:[#allocation26_spill] sm:$0xff] %v4397_v45  ;;  %v1797_v45 = vadd.f32 %v1702_v34, %v1535_v26  ;;  %v2064_v39 = vadd.f32 %v1977_v42, %v1799_v11  ;;  %v1544_v42 = vadd.f32 %v4335_v12, %v1282_v51  ;;  %v4578_v11 = vld [vmem:[#allocation7_spill] sm:$0xff]  ;;  %v4584_v51 = vld [vmem:[#allocation14_spill] sm:$0xff] }
 0x17c   : > { %v4402_v25 = vpop.f32.mrf.mxu0  ;;  %v2065_v32 = vadd.f32 %v3350_v38, %v1800_v7  ;;  %v2067_v53 = vadd.f32 %v4365_v41, %v1802_v33  ;;  %v1286_v7 = vadd.f32 %v4349_v21, %v4308_v46 }
 0x17d   : > { %v4400_v60 = vpop.f32.mrf.mxu1  ;;  %v2062_v29 = vadd.f32 %v1967_v36, %v1797_v45  ;;  %v1801_v45 = vadd.f32 %v1722_v48, %v1539_v15  ;;  %v1284_v48 = vadd.f32 %v4341_v16, %v4304_v35  ;;  %v1806_v35 = vadd.f32 %v4377_v30, %v1544_v42  ;;  %v4576_v40 = vld [vmem:[#allocation20_spill] sm:$0xff] }
 0x17e   : > { %v4407_v24 = vpop.f32.mrf.mxu0  ;;  %v1805_v18 = vadd.f32 %v4576_v40, %v1543_v43 }
 0x17f   : > { %v4405_v22 = vpop.f32.mrf.mxu1  ;;  %v2066_v47 = vadd.f32 %v4367_v50, %v1801_v45  ;;  %v1546_v55 = vadd.f32 %v4343_v17, %v1284_v48  ;;  %v4581_v46 = vld [vmem:[#allocation22_spill] sm:$0xff]  ;;  %v4585_v45 = vld [vmem:[#allocation21_spill] sm:$0xff] }
 0x180   : > { %v4414_v58 = vpop.f32.mrf.mxu0 }
 0x181   : > { %v4412_v3 = vpop.f32.mrf.mxu1  ;;  %v1808_v21 = vadd.f32 %v4581_v46, %v1546_v55  ;;  %v4593_v55 = vld [vmem:[#allocation17_spill] sm:$0xff] }
 0x182   : > { %v3399_v28 = vpop.f32.mrf.mxu0 }
 0x183   : > { %v3373_v49 = vpop.f32.mrf.mxu1 }
 0x184   : > { %v2325_v2 = vadd.f32 %v3373_v49, %v2063_v61  ;;  %v2491_v1 = vpop.f32.mrf.mxu0  ;;  %v2069_v61 = vadd.f32 %v4371_v54, %v1804_v57  ;;  %v4575_v49 = vld [vmem:[#allocation18_spill] sm:$0xff]  ;;  %v4588_v57 = vld [vmem:[#allocation9_spill] sm:$0xff] }
 0x185   : > { %v2229_v26 = vpop.f32.mrf.mxu1 }
 0x186   : > { %v2587_v34 = vadd.f32 %v3399_v28, %v2325_v2  ;;  %v2324_v37 = vadd.f32 %v2229_v26, %v2062_v29  ;;  %v3402_v36 = vpop.f32.mrf.mxu0  ;;  %v2068_v28 = vadd.f32 %v4575_v49, %v1803_v31  ;;  %v4577_v29 = vld [vmem:[#allocation10_spill] sm:$0xff]  ;;  %v4579_v2 = vld [vmem:[#allocation12_spill] sm:$0xff]  ;;  %v4580_v26 = vld [vmem:[#allocation19_spill] sm:$0xff] }
 0x187   : > { %v3376_v6 = vpop.f32.mrf.mxu1  ;;  %v1545_v30 = vadd.f32 %v4577_v29, %v1283_v56  ;;  %v1285_v15 = vadd.f32 %v4579_v2, %v4578_v11 }
 0x188   : > { %2635 = vst [vmem:[%s3691_s7 + $0x8] sm:$0xff] %v2587_v34  ;;  %v2586_v5 = vadd.f32 %v2491_v1, %v2324_v37  ;;  %v2327_v59 = vadd.f32 %v3376_v6, %v2065_v32  ;;  %v2501_v44 = vpop.f32.mrf.mxu0  ;;  %v2071_v1 = vadd.f32 %v4580_v26, %v1806_v35  ;;  %v4582_v34 = vld [vmem:[#allocation11_spill] sm:$0xff]  ;;  %v1288_v6 = vadd.f32 %v4584_v51, %v4583_v19 }
 0x189   : > { %v2239_v38 = vpop.f32.mrf.mxu1  ;;  %v1548_v37 = vadd.f32 %v4582_v34, %v1286_v7 }
 0x18a   : > { %2634 = vst [vmem:[%s3691_s7] sm:$0xff] %v2586_v5  ;;  %v2589_v27 = vadd.f32 %v3402_v36, %v2327_v59  ;;  %v2326_v10 = vadd.f32 %v2239_v38, %v2064_v39  ;;  %v3405_v9 = vpop.f32.mrf.mxu0  ;;  %v2070_v5 = vadd.f32 %v4585_v45, %v1805_v18  ;;  %v4586_v59 = vld [vmem:[#allocation24_spill] sm:$0xff] }
 0x18b   : > { %v3379_v63 = vpop.f32.mrf.mxu1  ;;  %v1807_v23 = vadd.f32 %v4586_v59, %v1545_v30 }
 0x18c   : > { %2637 = vst [vmem:[%s3691_s7 + $0x18] sm:$0xff] %v2589_v27  ;;  %v2588_v13 = vadd.f32 %v2501_v44, %v2326_v10  ;;  %v2329_v41 = vadd.f32 %v3379_v63, %v2067_v53  ;;  %v2511_v12 = vpop.f32.mrf.mxu0  ;;  %v4587_v44 = vld [vmem:[#allocation13_spill] sm:$0xff]  ;;  %v4589_v27 = vld [vmem:[#allocation16_spill] sm:$0xff]  ;;  %v4590_v63 = vld [vmem:[#allocation23_spill] sm:$0xff] }
 0x18d   : > { %v2249_v52 = vpop.f32.mrf.mxu1  ;;  %v1547_v53 = vadd.f32 %v4587_v44, %v1285_v15  ;;  %v1287_v10 = vadd.f32 %v4589_v27, %v4588_v57 }
 0x18e   : > { %2636 = vst [vmem:[%s3691_s7 + $0x10] sm:$0xff] %v2588_v13  ;;  %v2591_v16 = vadd.f32 %v3405_v9, %v2329_v41  ;;  %v2328_v50 = vadd.f32 %v2249_v52, %v2066_v47  ;;  %v3408_v14 = vpop.f32.mrf.mxu0  ;;  %v2073_v9 = vadd.f32 %v4590_v63, %v1808_v21  ;;  %v1810_v47 = vadd.f32 %v4395_v20, %v1548_v37  ;;  %v4591_v41 = vld [vmem:[#allocation15_spill] sm:$0xff] }
 0x18f   : > { %v3382_v62 = vpop.f32.mrf.mxu1  ;;  %v1550_v43 = vadd.f32 %v4591_v41, %v1288_v6  ;;  %v1809_v35 = vadd.f32 %v4400_v60, %v1547_v53  ;;  %v1549_v20 = vadd.f32 %v4593_v55, %v1287_v10 }
 0x190   : > { %2639 = vst [vmem:[%s3691_s7 + $0x28] sm:$0xff] %v2591_v16  ;;  %v2590_v0 = vadd.f32 %v2511_v12, %v2328_v50  ;;  %v2331_v54 = vadd.f32 %v3382_v62, %v2069_v61  ;;  %v2521_v17 = vpop.f32.mrf.mxu0  ;;  %v4592_v12 = vld [vmem:[#allocation25_spill] sm:$0xff] }
 0x191   : > { %v2259_v4 = vpop.f32.mrf.mxu1  ;;  %v2072_v61 = vadd.f32 %v4592_v12, %v1807_v23  ;;  %v1811_v29 = vadd.f32 %v4412_v3, %v1549_v20 }
 0x192   : > { %2638 = vst [vmem:[%s3691_s7 + $0x20] sm:$0xff] %v2590_v0  ;;  %v2593_v32 = vadd.f32 %v3408_v14, %v2331_v54  ;;  %v2330_v33 = vadd.f32 %v2259_v4, %v2068_v28  ;;  %v3411_v39 = vpop.f32.mrf.mxu0  ;;  %v4594_v14 = vld [vmem:[#allocation26_spill] sm:$0xff]  ;;  %v1812_v28 = vadd.f32 %v4405_v22, %v1550_v43  ;;  %v2074_v54 = vadd.f32 %v4402_v25, %v1809_v35 }
 0x193   : > { %v3385_v36 = vpop.f32.mrf.mxu1  ;;  %v2075_v49 = vadd.f32 %v4594_v14, %v1810_v47  ;;  %v2076_v25 = vadd.f32 %v4414_v58, %v1811_v29 }
 0x194   : > { %2641 = vst [vmem:[%s3691_s7 + $0x38] sm:$0xff] %v2593_v32  ;;  %v2592_v8 = vadd.f32 %v2521_v17, %v2330_v33  ;;  %v2333_v38 = vadd.f32 %v3385_v36, %v2071_v1  ;;  %v2531_v48 = vpop.f32.mrf.mxu0  ;;  %v2077_v15 = vadd.f32 %v4407_v24, %v1812_v28 }
 0x195   : > { %v2269_v42 = vpop.f32.mrf.mxu1 }
 0x196   : > { %2640 = vst [vmem:[%s3691_s7 + $0x30] sm:$0xff] %v2592_v8  ;;  %v2595_v31 = vadd.f32 %v3411_v39, %v2333_v38  ;;  %v2332_v13 = vadd.f32 %v2269_v42, %v2070_v5  ;;  %v3414_v52 = vpop.f32.mrf.mxu0 }
 0x197   : > { %v3388_v56 = vpop.f32.mrf.mxu1 }
 0x198   : > { %2643 = vst [vmem:[%s3691_s7 + $0x48] sm:$0xff] %v2595_v31  ;;  %v2594_v16 = vadd.f32 %v2531_v48, %v2332_v13  ;;  %v2335_v50 = vadd.f32 %v3388_v56, %v2073_v9  ;;  %v2541_v62 = vpop.f32.mrf.mxu0 }
 0x199   : > { %v2279_v7 = vpop.f32.mrf.mxu1 }
 0x19a   : > { %2642 = vst [vmem:[%s3691_s7 + $0x40] sm:$0xff] %v2594_v16  ;;  %v2597_v40 = vadd.f32 %v3414_v52, %v2335_v50  ;;  %v2334_v18 = vadd.f32 %v2279_v7, %v2072_v61  ;;  %v3417_v60 = vpop.f32.mrf.mxu0 }
 0x19b   : > { %v3391_v0 = vpop.f32.mrf.mxu1 }
 0x19c   : > { %2645 = vst [vmem:[%s3691_s7 + $0x58] sm:$0xff] %v2597_v40  ;;  %v2596_v30 = vadd.f32 %v2541_v62, %v2334_v18  ;;  %v2337_v11 = vadd.f32 %v3391_v0, %v2075_v49  ;;  %v2551_v22 = vpop.f32.mrf.mxu0 }
 0x19d   : > { %v2289_v2 = vpop.f32.mrf.mxu1 }
 0x19e   : > { %2644 = vst [vmem:[%s3691_s7 + $0x50] sm:$0xff] %v2596_v30  ;;  %v2599_v4 = vadd.f32 %v3417_v60, %v2337_v11  ;;  %v2336_v17 = vadd.f32 %v2289_v2, %v2074_v54  ;;  %v3420_v1 = vpop.f32.mrf.mxu0 }
 0x19f   : > { %v3394_v26 = vpop.f32.mrf.mxu1 }
 0x1a0   : > { %2647 = vst [vmem:[%s3691_s7 + $0x68] sm:$0xff] %v2599_v4  ;;  %v2598_v3 = vadd.f32 %v2551_v22, %v2336_v17  ;;  %v2339_v46 = vadd.f32 %v3394_v26, %v2077_v15  ;;  %v2561_v33 = vpop.f32.mrf.mxu0 }
 0x1a1   : > { %v2299_v21 = vpop.f32.mrf.mxu1 }
 0x1a2   : > { %2646 = vst [vmem:[%s3691_s7 + $0x60] sm:$0xff] %v2598_v3  ;;  %v2601_v32 = vadd.f32 %v3420_v1, %v2339_v46  ;;  %v2338_v24 = vadd.f32 %v2299_v21, %v2076_v25 }
 0x1a4   : > { %2649 = vst [vmem:[%s3691_s7 + $0x78] sm:$0xff] %v2601_v32  ;;  %v2600_v58 = vadd.f32 %v2561_v33, %v2338_v24 }
 0x1a6   : > { %2648 = vst [vmem:[%s3691_s7 + $0x70] sm:$0xff] %v2600_v58 }
 0x1a7   : > { %3510 = shalt.err (!%p3507_p7)
}
 0x1a8   : > { %s3511_s28 = scalar_lea.hbm %s4491_s6, 2048  ;;  %s3515_s26 = scalar_lea.hbm %s4552_s2, 8192 }
 0x1a9   : > { %p3512_p9 = scmp.ne.s32.totalorder %s4491_s6, %s3511_s28  ;;  %p3516_p12 = scmp.lt.s32.totalorder %s4491_s6, %s4552_s2 }
 0x1aa   : > { %p3517_p13 = scmp.lt.s32.totalorder %s3515_s26, %s3511_s28 }
 0x1ab   : > { %p3513_p10 = pnand %p3512_p9, %p3661_p3 }
 0x1ac   : > { %p3518_p0 = por %p3517_p13, %p3516_p12 }
 0x1ad   : > { %p3514_p11 = pneg %p3513_p10 }
 0x1af   : > { %p3519_p1 = pnand %p3518_p0, %p3514_p11 }
 0x1b1   : > { %3522 = shalt.err (!%p3519_p1)
}
 0x1b2   : > { %s3593_s3 = smov 128   ;;  %s3594_s12 = smov 8  }
 0x1b3   : > { %3423 = dma.vmem_to_hbm [thread:$0]  (%p3661_p3), %s4493_s13, 2048, %s4491_s6, %s4499_s8, %s3593_s3, %s3593_s3, %s3594_s12  }
 0x1b4 PF: > { %p3429_p2 = scmp.ge.s32.totalorder %s3589_s16, 2  ;;  %s2682_s4 = sand.u32 1, %s3561_s9  }
 0x1b5   : > { %s2683_s5 = scalar_lea.sflag [#allocation5], %s2682_s4 }
 0x1b6   : > { %p3426_p4 = pnand %p3429_p2, %p3670_p8 }
 0x1b8   : > { %p3427_p5 = pneg %p3426_p4 }
 0x1ba   : > { %3556 = dma.done.wait (%p3427_p5), %s2683_s5, 2048  }
 0x1bb   : > { %3558 = vsyncadd (%p3427_p5), %s2683_s5, 4294965248  ;;  %s15_s16 = sadd.s32 1, %s3589_s16   ;;  %s4595_s9 = smov %s3565_s10 }
 0x1bc   : > { %p12_p6 = scmp.ge.s32.totalorder %s15_s16, 6   ;;  %s4596_s10 = smov %s3569_s11 }
 0x1bd   : > { %s4597_s11 = smov %s3679_s27  ;;  %s4598_s12 = smov %s3581_s14 }
 0x1be   : > { %s4599_s13 = smov %s3585_s15  ;;  %s4600_s14 = smov %s4603_s19 }
 0x1bf   : > { %s4601_s15 = smov %s4607_s20  ;;  %14 = sbr.rel (!%p12_p6) target bundleno = 5 (0x5), region = 79 }
 0x1c4   :  { %2688 = vsyncpa [#allocation5], 1 }
 0x1c5   :  { %2690 = vsyncpa [#allocation5 + $0x1], 1 }

</bundles_post_ra>
